<compile_context>
chip_gen: v6e
topology: v6e:2x2x1
jax: 0.10.0
libtpu: 0.0.40
codegen_flags: <defaults>
</compile_context>

<pallas_src>
import jax
import jax.numpy as jnp
from jax import lax
from jax.experimental import pallas as pl
from jax.experimental.pallas import tpu as pltpu


def _gsr_kernel(a_ref, ut_ref, x_ref, adj_ref, xout_ref):
    """One grid step = Bblk samples.

    a_ref:    (hr, lr)        f32  shared: W[:, :lr] + W[:, lr:]
    ut_ref:   (lr, Bblk*lr)   f32  U_i^T stacked along lanes
    x_ref:    (Bblk, lr, hr)  f32  node features
    adj_ref:  (hr, Bblk*hr)   f32  adjacency slabs (lane-dense)
    xout_ref: (hr, Bblk*hr)   f32  output-feature slabs (lane-dense)
    """
    hr, lr = a_ref.shape
    bblk = x_ref.shape[0]

    # b for ALL samples in one MXU matmul: (hr, lr) @ (lr, Bblk*lr).
    # b_all[:, i*lr:(i+1)*lr] == a @ U_i^T
    b_all = jnp.dot(a_ref[...], ut_ref[...],
                    preferred_element_type=jnp.float32)

    row = lax.broadcasted_iota(jnp.int32, (hr, hr), 0)
    col = lax.broadcasted_iota(jnp.int32, (hr, hr), 1)
    diag = row == col
    one = jnp.float32(1.0)

    adj_tiles = []
    gram_tiles = []
    for i in range(bblk):  # static unroll over the small per-step sample block
        b_i = b_all[:, i * lr:(i + 1) * lr]                       # (hr, lr)
        # f_d = |b @ X|
        f_i = jnp.abs(jnp.dot(b_i, x_ref[i],
                              preferred_element_type=jnp.float32))  # (hr, hr)
        adj_i = jnp.where(diag, one, f_i)
        # gram = adj @ adj.T (contraction over dim 1 of both operands).
        # Exactly symmetric and >= 0, so (X+X.T)/2 and abs are no-ops.
        gram_i = lax.dot_general(adj_i, adj_i, (((1,), (1,)), ((), ())),
                                 preferred_element_type=jnp.float32)
        adj_tiles.append(adj_i)
        gram_tiles.append(jnp.where(diag, one, gram_i))

    # Single unmasked, lane-dense stores of the whole (hr, Bblk*hr) slabs.
    adj_ref[...] = jnp.concatenate(adj_tiles, axis=1)
    xout_ref[...] = jnp.concatenate(gram_tiles, axis=1)


def _pick_block_batch(B, lr_dim, hr_dim):
    """Samples per grid step.

    A block size d != B is only layout-legal if both per-step lane extents
    (d*lr for the stacked U^T, d*hr for the output slabs) are multiples of
    128.  Preference order: fits a conservative VMEM budget (double-buffered),
    keeps >= 2 grid steps (v7x megacore sharding), lane-dense outputs, then
    largest d (amortize per-step overhead).
    """
    bytes_per_sample = 4 * (lr_dim * lr_dim + lr_dim * hr_dim
                            + 2 * hr_dim * hr_dim)
    vmem_budget = 16 << 20  # well under 32 MiB scoped default / 64 MiB v7x
    best, best_score = B, None
    for d in range(1, B + 1):
        if B % d:
            continue
        if d != B and ((d * hr_dim) % 128 or (d * lr_dim) % 128):
            continue
        score = (2 * d * bytes_per_sample <= vmem_budget,
                 (B // d) >= 2 or B == 1,
                 (d * hr_dim) % 128 == 0,
                 d)
        if best_score is None or score > best_score:
            best, best_score = d, score
    return best


def gsr_layer_batched(A, X, weights, *, block_batch=None):
    """Batched GSRLayer forward.

    A:       (B, lr, lr) symmetric adjacency matrices
    X:       (B, lr, hr) node features
    weights: (hr, hr)    shared layer weights
    returns  adj, Xn each (B, hr, hr)
    """
    A = A.astype(jnp.float32)
    X = X.astype(jnp.float32)
    weights = weights.astype(jnp.float32)

    B, lr_dim, _ = A.shape
    hr_dim = weights.shape[0]
    assert hr_dim == 2 * lr_dim, "GSRLayer requires hr_dim == 2 * lr_dim"
    assert X.shape == (B, lr_dim, hr_dim)

    # TODO(synk): eigendecomposition has no Pallas primitive; computed with
    # jnp.linalg.eigh (matches torch.linalg.eigh(A, UPLO='U') up to the usual
    # eigenvector sign/order ambiguity).
    _, U_lr = jnp.linalg.eigh(A, UPLO="U", symmetrize_input=False)  # (B,lr,lr)

    # a = W @ [I; I] == left column-half + right column-half.  Hoisted: it is
    # sample-independent and the lr-offset lane slice is misaligned in-kernel.
    a = weights[:, :lr_dim] + weights[:, lr_dim:]                   # (hr, lr)

    # U_i^T stacked along the lane axis: ut[:, i*lr:(i+1)*lr] = U_i^T.
    ut = jnp.transpose(U_lr, (2, 0, 1)).reshape(lr_dim, B * lr_dim)

    bblk = block_batch if block_batch is not None else _pick_block_batch(
        B, lr_dim, hr_dim)
    assert B % bblk == 0
    steps = B // bblk

    flops_per_sample = 2 * (hr_dim * lr_dim * lr_dim      # a @ U.T
                            + hr_dim * lr_dim * hr_dim    # b @ X
                            + hr_dim * hr_dim * hr_dim)   # adj @ adj.T
    bytes_accessed = 4 * (hr_dim * lr_dim                 # a
                          + B * (lr_dim * lr_dim          # U^T
                                 + lr_dim * hr_dim        # X
                                 + 2 * hr_dim * hr_dim))  # outputs

    adj_s, xout_s = pl.pallas_call(
        _gsr_kernel,
        out_shape=(
            jax.ShapeDtypeStruct((hr_dim, B * hr_dim), jnp.float32),
            jax.ShapeDtypeStruct((hr_dim, B * hr_dim), jnp.float32),
        ),
        grid=(steps,),
        in_specs=[
            # Shared (hr, lr) matrix: same block every step.
            pl.BlockSpec((hr_dim, lr_dim), lambda g: (0, 0)),
            # Lane-stacked U^T for the Bblk samples of this step.
            pl.BlockSpec((lr_dim, bblk * lr_dim), lambda g: (0, g)),
            # Per-step batch slice of X (last two dims = full array dims).
            pl.BlockSpec((bblk, lr_dim, hr_dim), lambda g: (g, 0, 0)),
        ],
        out_specs=(
            pl.BlockSpec((hr_dim, bblk * hr_dim), lambda g: (0, g)),
            pl.BlockSpec((hr_dim, bblk * hr_dim), lambda g: (0, g)),
        ),
        compiler_params=pltpu.CompilerParams(
            dimension_semantics=("parallel",)),
        cost_estimate=pl.CostEstimate(
            flops=B * flops_per_sample,
            transcendentals=0,
            bytes_accessed=bytes_accessed),
    )(a, ut, X)

    # (hr, B*hr) slabs -> (B, hr, hr).  Wrapper-side layout plumbing.
    adj = jnp.transpose(adj_s.reshape(hr_dim, B, hr_dim), (1, 0, 2))
    x_out = jnp.transpose(xout_s.reshape(hr_dim, B, hr_dim), (1, 0, 2))
    return adj, x_out


def gsr_layer(A, X, weights):
    """Single-sample forward, matching the PyTorch module signature."""
    adj, x_out = gsr_layer_batched(A[None], X[None], weights)
    return adj[0], x_out[0]


def _reference(A, X, W):
    """Pure-JAX reference (same eigh, fp32, highest precision)."""
    B, lr, _ = A.shape
    hr = W.shape[0]
    _, U = jnp.linalg.eigh(A, UPLO="U", symmetrize_input=False)
    a = W[:, :lr] + W[:, lr:]
    b = jnp.einsum("hk,bjk->bhj", a, U, precision=lax.Precision.HIGHEST)
    f = jnp.abs(jnp.einsum("bhj,bjd->bhd", b, X,
                           precision=lax.Precision.HIGHEST))
    eye = jnp.eye(hr, dtype=bool)
    adj = jnp.where(eye, 1.0, f)
    gram = jnp.einsum("bij,bkj->bik", adj, adj,
                      precision=lax.Precision.HIGHEST)
    gram = (gram + jnp.swapaxes(gram, -1, -2)) / 2.0
    x_out = jnp.abs(jnp.where(eye, 1.0, gram))
    return adj, x_out


if __name__ == "__main__":
    key = jax.random.PRNGKey(0)
    k_a, k_x, k_w = jax.random.split(key, 3)

    batch = 16           # -> Bblk = 8 samples/step, grid = 2, 256-lane slabs
    lr_dim = 16
    hr_dim = 2 * lr_dim  # 32

    # Symmetric low-resolution adjacency matrices A (batch, lr, lr).
    A0 = jax.random.uniform(k_a, (batch, lr_dim, lr_dim), dtype=jnp.float32)
    A = (A0 + jnp.swapaxes(A0, -1, -2)) / 2.0

    # Node features X (batch, lr, hr).
    X = jax.random.uniform(k_x, (batch, lr_dim, hr_dim), dtype=jnp.float32)

    # Glorot-uniform weights (hr, hr): U(-sqrt(6/(2*hr)), +sqrt(6/(2*hr))).
    init_range = float(jnp.sqrt(6.0 / (hr_dim + hr_dim)))
    weights = jax.random.uniform(
        k_w, (hr_dim, hr_dim), minval=-init_range, maxval=init_range,
        dtype=jnp.float32)

    # Batched path (grid over batch blocks, "parallel").
    adj_b, x_b = jax.jit(gsr_layer_batched)(A, X, weights)
    # Single-sample path (module-equivalent signature).
    adj_1, x_1 = jax.jit(gsr_layer)(A[0], X[0], weights)
    jax.block_until_ready((adj_b, x_b, adj_1, x_1))

    assert adj_b.shape == (batch, hr_dim, hr_dim)
    assert x_b.shape == (batch, hr_dim, hr_dim)
    assert adj_1.shape == (hr_dim, hr_dim) and x_1.shape == (hr_dim, hr_dim)

    # Numerical check against a pure-JAX reference using the same eigh.
    adj_r, x_r = jax.jit(_reference)(A, X, weights)
    assert jnp.allclose(adj_b, adj_r, rtol=1e-2, atol=1e-2)
    assert jnp.allclose(x_b, x_r, rtol=1e-2, atol=1e-2)
    assert jnp.allclose(adj_1, adj_r[0], rtol=1e-2, atol=1e-2)
    assert jnp.allclose(x_1, x_r[0], rtol=1e-2, atol=1e-2)

    print("KERNEL_OK")
</pallas_src>

<mosaic_0001>
module attributes {stable_mosaic.version = 11 : i64} {
  func.func @_gsr_kernel(%arg0: i32, %arg1: memref<32x16xf32, #tpu.memory_space<vmem>>, %arg2: memref<16x128xf32, #tpu.memory_space<vmem>>, %arg3: memref<8x16x32xf32, #tpu.memory_space<vmem>>, %arg4: memref<32x256xf32, #tpu.memory_space<vmem>>, %arg5: memref<32x256xf32, #tpu.memory_space<vmem>>) attributes {dimension_semantics = [#tpu.dimension_semantics<parallel>], iteration_bounds = array<i64: 2>, scalar_prefetch = 0 : i64, scratch_operands = 0 : i64, tpu.core_type = #tpu.core_type<tc>, window_params = [{pipeline_mode = #tpu.pipeline_mode<synchronous>, transform_indices = @transform_0, window_bounds = array<i64: 32, 16>}, {transform_indices = @transform_1, window_bounds = array<i64: 16, 128>}, {transform_indices = @transform_2, window_bounds = array<i64: 8, 16, 32>}, {transform_indices = @transform_3, window_bounds = array<i64: 32, 256>}, {transform_indices = @transform_4, window_bounds = array<i64: 32, 256>}]} {
    %c0 = arith.constant 0 : index
    %c0_0 = arith.constant 0 : index
    %0 = vector.load %arg1[%c0, %c0_0] : memref<32x16xf32, #tpu.memory_space<vmem>>, vector<32x16xf32>
    %c0_1 = arith.constant 0 : index
    %c0_2 = arith.constant 0 : index
    %1 = vector.load %arg2[%c0_1, %c0_2] : memref<16x128xf32, #tpu.memory_space<vmem>>, vector<16x128xf32>
    %cst = arith.constant dense<0.000000e+00> : vector<32x128xf32>
    %2 = tpu.matmul %0, %1, %cst {dimension_numbers = #tpu.dot_dimension_numbers<[1], [0], [0], [1], [0, 0, 1, 1], [], []>} : vector<32x16xf32>, vector<16x128xf32>, vector<32x128xf32> -> vector<32x128xf32>
    %3 = tpu.iota {dimensions = array<i32: 0>} : vector<32x32xi32>
    %4 = tpu.iota {dimensions = array<i32: 1>} : vector<32x32xi32>
    %5 = arith.cmpi eq, %3, %4 : vector<32x32xi32>
    %6 = vector.extract_strided_slice %2 {offsets = [0, 0], sizes = [32, 16], strides = [1, 1]} : vector<32x128xf32> to vector<32x16xf32>
    %c0_3 = arith.constant 0 : index
    %c0_4 = arith.constant 0 : index
    %c0_5 = arith.constant 0 : index
    %7 = vector.load %arg3[%c0_3, %c0_4, %c0_5] : memref<8x16x32xf32, #tpu.memory_space<vmem>>, vector<1x16x32xf32>
    %8 = vector.shape_cast %7 : vector<1x16x32xf32> to vector<16x32xf32>
    %cst_6 = arith.constant dense<0.000000e+00> : vector<32x32xf32>
    %9 = tpu.matmul %6, %8, %cst_6 {dimension_numbers = #tpu.dot_dimension_numbers<[1], [0], [0], [1], [0, 0, 1, 1], [], []>} : vector<32x16xf32>, vector<16x32xf32>, vector<32x32xf32> -> vector<32x32xf32>
    %10 = math.absf %9 : vector<32x32xf32>
    %cst_7 = arith.constant 1.000000e+00 : f32
    %11 = vector.broadcast %cst_7 : f32 to vector<32x32xf32>
    %12 = arith.select %5, %11, %10 : vector<32x32xi1>, vector<32x32xf32>
    %cst_8 = arith.constant dense<0.000000e+00> : vector<32x32xf32>
    %13 = tpu.matmul %12, %12, %cst_8 {dimension_numbers = #tpu.dot_dimension_numbers<[1], [1], [0], [0], [0, 0, 1, 0], [], []>} : vector<32x32xf32>, vector<32x32xf32>, vector<32x32xf32> -> vector<32x32xf32>
    %cst_9 = arith.constant 1.000000e+00 : f32
    %14 = vector.broadcast %cst_9 : f32 to vector<32x32xf32>
    %15 = arith.select %5, %14, %13 : vector<32x32xi1>, vector<32x32xf32>
    %16 = vector.extract_strided_slice %2 {offsets = [0, 16], sizes = [32, 16], strides = [1, 1]} : vector<32x128xf32> to vector<32x16xf32>
    %c1 = arith.constant 1 : index
    %c0_10 = arith.constant 0 : index
    %c0_11 = arith.constant 0 : index
    %17 = vector.load %arg3[%c1, %c0_10, %c0_11] : memref<8x16x32xf32, #tpu.memory_space<vmem>>, vector<1x16x32xf32>
    %18 = vector.shape_cast %17 : vector<1x16x32xf32> to vector<16x32xf32>
    %cst_12 = arith.constant dense<0.000000e+00> : vector<32x32xf32>
    %19 = tpu.matmul %16, %18, %cst_12 {dimension_numbers = #tpu.dot_dimension_numbers<[1], [0], [0], [1], [0, 0, 1, 1], [], []>} : vector<32x16xf32>, vector<16x32xf32>, vector<32x32xf32> -> vector<32x32xf32>
    %20 = math.absf %19 : vector<32x32xf32>
    %cst_13 = arith.constant 1.000000e+00 : f32
    %21 = vector.broadcast %cst_13 : f32 to vector<32x32xf32>
    %22 = arith.select %5, %21, %20 : vector<32x32xi1>, vector<32x32xf32>
    %cst_14 = arith.constant dense<0.000000e+00> : vector<32x32xf32>
    %23 = tpu.matmul %22, %22, %cst_14 {dimension_numbers = #tpu.dot_dimension_numbers<[1], [1], [0], [0], [0, 0, 1, 0], [], []>} : vector<32x32xf32>, vector<32x32xf32>, vector<32x32xf32> -> vector<32x32xf32>
    %cst_15 = arith.constant 1.000000e+00 : f32
    %24 = vector.broadcast %cst_15 : f32 to vector<32x32xf32>
    %25 = arith.select %5, %24, %23 : vector<32x32xi1>, vector<32x32xf32>
    %26 = vector.extract_strided_slice %2 {offsets = [0, 32], sizes = [32, 16], strides = [1, 1]} : vector<32x128xf32> to vector<32x16xf32>
    %c2 = arith.constant 2 : index
    %c0_16 = arith.constant 0 : index
    %c0_17 = arith.constant 0 : index
    %27 = vector.load %arg3[%c2, %c0_16, %c0_17] : memref<8x16x32xf32, #tpu.memory_space<vmem>>, vector<1x16x32xf32>
    %28 = vector.shape_cast %27 : vector<1x16x32xf32> to vector<16x32xf32>
    %cst_18 = arith.constant dense<0.000000e+00> : vector<32x32xf32>
    %29 = tpu.matmul %26, %28, %cst_18 {dimension_numbers = #tpu.dot_dimension_numbers<[1], [0], [0], [1], [0, 0, 1, 1], [], []>} : vector<32x16xf32>, vector<16x32xf32>, vector<32x32xf32> -> vector<32x32xf32>
    %30 = math.absf %29 : vector<32x32xf32>
    %cst_19 = arith.constant 1.000000e+00 : f32
    %31 = vector.broadcast %cst_19 : f32 to vector<32x32xf32>
    %32 = arith.select %5, %31, %30 : vector<32x32xi1>, vector<32x32xf32>
    %cst_20 = arith.constant dense<0.000000e+00> : vector<32x32xf32>
    %33 = tpu.matmul %32, %32, %cst_20 {dimension_numbers = #tpu.dot_dimension_numbers<[1], [1], [0], [0], [0, 0, 1, 0], [], []>} : vector<32x32xf32>, vector<32x32xf32>, vector<32x32xf32> -> vector<32x32xf32>
    %cst_21 = arith.constant 1.000000e+00 : f32
    %34 = vector.broadcast %cst_21 : f32 to vector<32x32xf32>
    %35 = arith.select %5, %34, %33 : vector<32x32xi1>, vector<32x32xf32>
    %36 = vector.extract_strided_slice %2 {offsets = [0, 48], sizes = [32, 16], strides = [1, 1]} : vector<32x128xf32> to vector<32x16xf32>
    %c3 = arith.constant 3 : index
    %c0_22 = arith.constant 0 : index
    %c0_23 = arith.constant 0 : index
    %37 = vector.load %arg3[%c3, %c0_22, %c0_23] : memref<8x16x32xf32, #tpu.memory_space<vmem>>, vector<1x16x32xf32>
    %38 = vector.shape_cast %37 : vector<1x16x32xf32> to vector<16x32xf32>
    %cst_24 = arith.constant dense<0.000000e+00> : vector<32x32xf32>
    %39 = tpu.matmul %36, %38, %cst_24 {dimension_numbers = #tpu.dot_dimension_numbers<[1], [0], [0], [1], [0, 0, 1, 1], [], []>} : vector<32x16xf32>, vector<16x32xf32>, vector<32x32xf32> -> vector<32x32xf32>
    %40 = math.absf %39 : vector<32x32xf32>
    %cst_25 = arith.constant 1.000000e+00 : f32
    %41 = vector.broadcast %cst_25 : f32 to vector<32x32xf32>
    %42 = arith.select %5, %41, %40 : vector<32x32xi1>, vector<32x32xf32>
    %cst_26 = arith.constant dense<0.000000e+00> : vector<32x32xf32>
    %43 = tpu.matmul %42, %42, %cst_26 {dimension_numbers = #tpu.dot_dimension_numbers<[1], [1], [0], [0], [0, 0, 1, 0], [], []>} : vector<32x32xf32>, vector<32x32xf32>, vector<32x32xf32> -> vector<32x32xf32>
    %cst_27 = arith.constant 1.000000e+00 : f32
    %44 = vector.broadcast %cst_27 : f32 to vector<32x32xf32>
    %45 = arith.select %5, %44, %43 : vector<32x32xi1>, vector<32x32xf32>
    %46 = vector.extract_strided_slice %2 {offsets = [0, 64], sizes = [32, 16], strides = [1, 1]} : vector<32x128xf32> to vector<32x16xf32>
    %c4 = arith.constant 4 : index
    %c0_28 = arith.constant 0 : index
    %c0_29 = arith.constant 0 : index
    %47 = vector.load %arg3[%c4, %c0_28, %c0_29] : memref<8x16x32xf32, #tpu.memory_space<vmem>>, vector<1x16x32xf32>
    %48 = vector.shape_cast %47 : vector<1x16x32xf32> to vector<16x32xf32>
    %cst_30 = arith.constant dense<0.000000e+00> : vector<32x32xf32>
    %49 = tpu.matmul %46, %48, %cst_30 {dimension_numbers = #tpu.dot_dimension_numbers<[1], [0], [0], [1], [0, 0, 1, 1], [], []>} : vector<32x16xf32>, vector<16x32xf32>, vector<32x32xf32> -> vector<32x32xf32>
    %50 = math.absf %49 : vector<32x32xf32>
    %cst_31 = arith.constant 1.000000e+00 : f32
    %51 = vector.broadcast %cst_31 : f32 to vector<32x32xf32>
    %52 = arith.select %5, %51, %50 : vector<32x32xi1>, vector<32x32xf32>
    %cst_32 = arith.constant dense<0.000000e+00> : vector<32x32xf32>
    %53 = tpu.matmul %52, %52, %cst_32 {dimension_numbers = #tpu.dot_dimension_numbers<[1], [1], [0], [0], [0, 0, 1, 0], [], []>} : vector<32x32xf32>, vector<32x32xf32>, vector<32x32xf32> -> vector<32x32xf32>
    %cst_33 = arith.constant 1.000000e+00 : f32
    %54 = vector.broadcast %cst_33 : f32 to vector<32x32xf32>
    %55 = arith.select %5, %54, %53 : vector<32x32xi1>, vector<32x32xf32>
    %56 = vector.extract_strided_slice %2 {offsets = [0, 80], sizes = [32, 16], strides = [1, 1]} : vector<32x128xf32> to vector<32x16xf32>
    %c5 = arith.constant 5 : index
    %c0_34 = arith.constant 0 : index
    %c0_35 = arith.constant 0 : index
    %57 = vector.load %arg3[%c5, %c0_34, %c0_35] : memref<8x16x32xf32, #tpu.memory_space<vmem>>, vector<1x16x32xf32>
    %58 = vector.shape_cast %57 : vector<1x16x32xf32> to vector<16x32xf32>
    %cst_36 = arith.constant dense<0.000000e+00> : vector<32x32xf32>
    %59 = tpu.matmul %56, %58, %cst_36 {dimension_numbers = #tpu.dot_dimension_numbers<[1], [0], [0], [1], [0, 0, 1, 1], [], []>} : vector<32x16xf32>, vector<16x32xf32>, vector<32x32xf32> -> vector<32x32xf32>
    %60 = math.absf %59 : vector<32x32xf32>
    %cst_37 = arith.constant 1.000000e+00 : f32
    %61 = vector.broadcast %cst_37 : f32 to vector<32x32xf32>
    %62 = arith.select %5, %61, %60 : vector<32x32xi1>, vector<32x32xf32>
    %cst_38 = arith.constant dense<0.000000e+00> : vector<32x32xf32>
    %63 = tpu.matmul %62, %62, %cst_38 {dimension_numbers = #tpu.dot_dimension_numbers<[1], [1], [0], [0], [0, 0, 1, 0], [], []>} : vector<32x32xf32>, vector<32x32xf32>, vector<32x32xf32> -> vector<32x32xf32>
    %cst_39 = arith.constant 1.000000e+00 : f32
    %64 = vector.broadcast %cst_39 : f32 to vector<32x32xf32>
    %65 = arith.select %5, %64, %63 : vector<32x32xi1>, vector<32x32xf32>
    %66 = vector.extract_strided_slice %2 {offsets = [0, 96], sizes = [32, 16], strides = [1, 1]} : vector<32x128xf32> to vector<32x16xf32>
    %c6 = arith.constant 6 : index
    %c0_40 = arith.constant 0 : index
    %c0_41 = arith.constant 0 : index
    %67 = vector.load %arg3[%c6, %c0_40, %c0_41] : memref<8x16x32xf32, #tpu.memory_space<vmem>>, vector<1x16x32xf32>
    %68 = vector.shape_cast %67 : vector<1x16x32xf32> to vector<16x32xf32>
    %cst_42 = arith.constant dense<0.000000e+00> : vector<32x32xf32>
    %69 = tpu.matmul %66, %68, %cst_42 {dimension_numbers = #tpu.dot_dimension_numbers<[1], [0], [0], [1], [0, 0, 1, 1], [], []>} : vector<32x16xf32>, vector<16x32xf32>, vector<32x32xf32> -> vector<32x32xf32>
    %70 = math.absf %69 : vector<32x32xf32>
    %cst_43 = arith.constant 1.000000e+00 : f32
    %71 = vector.broadcast %cst_43 : f32 to vector<32x32xf32>
    %72 = arith.select %5, %71, %70 : vector<32x32xi1>, vector<32x32xf32>
    %cst_44 = arith.constant dense<0.000000e+00> : vector<32x32xf32>
    %73 = tpu.matmul %72, %72, %cst_44 {dimension_numbers = #tpu.dot_dimension_numbers<[1], [1], [0], [0], [0, 0, 1, 0], [], []>} : vector<32x32xf32>, vector<32x32xf32>, vector<32x32xf32> -> vector<32x32xf32>
    %cst_45 = arith.constant 1.000000e+00 : f32
    %74 = vector.broadcast %cst_45 : f32 to vector<32x32xf32>
    %75 = arith.select %5, %74, %73 : vector<32x32xi1>, vector<32x32xf32>
    %76 = vector.extract_strided_slice %2 {offsets = [0, 112], sizes = [32, 16], strides = [1, 1]} : vector<32x128xf32> to vector<32x16xf32>
    %c7 = arith.constant 7 : index
    %c0_46 = arith.constant 0 : index
    %c0_47 = arith.constant 0 : index
    %77 = vector.load %arg3[%c7, %c0_46, %c0_47] : memref<8x16x32xf32, #tpu.memory_space<vmem>>, vector<1x16x32xf32>
    %78 = vector.shape_cast %77 : vector<1x16x32xf32> to vector<16x32xf32>
    %cst_48 = arith.constant dense<0.000000e+00> : vector<32x32xf32>
    %79 = tpu.matmul %76, %78, %cst_48 {dimension_numbers = #tpu.dot_dimension_numbers<[1], [0], [0], [1], [0, 0, 1, 1], [], []>} : vector<32x16xf32>, vector<16x32xf32>, vector<32x32xf32> -> vector<32x32xf32>
    %80 = math.absf %79 : vector<32x32xf32>
    %cst_49 = arith.constant 1.000000e+00 : f32
    %81 = vector.broadcast %cst_49 : f32 to vector<32x32xf32>
    %82 = arith.select %5, %81, %80 : vector<32x32xi1>, vector<32x32xf32>
    %cst_50 = arith.constant dense<0.000000e+00> : vector<32x32xf32>
    %83 = tpu.matmul %82, %82, %cst_50 {dimension_numbers = #tpu.dot_dimension_numbers<[1], [1], [0], [0], [0, 0, 1, 0], [], []>} : vector<32x32xf32>, vector<32x32xf32>, vector<32x32xf32> -> vector<32x32xf32>
    %cst_51 = arith.constant 1.000000e+00 : f32
    %84 = vector.broadcast %cst_51 : f32 to vector<32x32xf32>
    %85 = arith.select %5, %84, %83 : vector<32x32xi1>, vector<32x32xf32>
    %86 = tpu.concatenate %12, %22, %32, %42, %52, %62, %72, %82 in 1 : vector<32x32xf32>, vector<32x32xf32>, vector<32x32xf32>, vector<32x32xf32>, vector<32x32xf32>, vector<32x32xf32>, vector<32x32xf32>, vector<32x32xf32> -> vector<32x256xf32>
    %c0_52 = arith.constant 0 : index
    %c0_53 = arith.constant 0 : index
    %87 = vector.load %arg4[%c0_52, %c0_53] : memref<32x256xf32, #tpu.memory_space<vmem>>, vector<32x256xf32>
    tpu.vector_store %arg4[%c0_52, %c0_53], %86 {strides = array<i32>} : memref<32x256xf32, #tpu.memory_space<vmem>>, vector<32x256xf32>,
    %88 = tpu.concatenate %15, %25, %35, %45, %55, %65, %75, %85 in 1 : vector<32x32xf32>, vector<32x32xf32>, vector<32x32xf32>, vector<32x32xf32>, vector<32x32xf32>, vector<32x32xf32>, vector<32x32xf32>, vector<32x32xf32> -> vector<32x256xf32>
    %c0_54 = arith.constant 0 : index
    %c0_55 = arith.constant 0 : index
    %89 = vector.load %arg5[%c0_54, %c0_55] : memref<32x256xf32, #tpu.memory_space<vmem>>, vector<32x256xf32>
    tpu.vector_store %arg5[%c0_54, %c0_55], %88 {strides = array<i32>} : memref<32x256xf32, #tpu.memory_space<vmem>>, vector<32x256xf32>,
    return
  }
  func.func @transform_0(%arg0: i32) -> (i32, i32) {
    %c0_i32 = arith.constant 0 : i32
    %c0_i32_0 = arith.constant 0 : i32
    %c0_i32_1 = arith.constant 0 : i32
    return %c0_i32, %c0_i32_0 : i32, i32
  }
  func.func @transform_1(%arg0: i32) -> (i32, i32) {
    %c0_i32 = arith.constant 0 : i32
    %c0_i32_0 = arith.constant 0 : i32
    return %c0_i32, %arg0 : i32, i32
  }
  func.func @transform_2(%arg0: i32) -> (i32, i32, i32) {
    %c0_i32 = arith.constant 0 : i32
    %c0_i32_0 = arith.constant 0 : i32
    %c0_i32_1 = arith.constant 0 : i32
    return %arg0, %c0_i32, %c0_i32_0 : i32, i32, i32
  }
  func.func @transform_3(%arg0: i32) -> (i32, i32) {
    %c0_i32 = arith.constant 0 : i32
    %c0_i32_0 = arith.constant 0 : i32
    return %c0_i32, %arg0 : i32, i32
  }
  func.func @transform_4(%arg0: i32) -> (i32, i32) {
    %c0_i32 = arith.constant 0 : i32
    %c0_i32_0 = arith.constant 0 : i32
    return %c0_i32, %arg0 : i32, i32
  }
}

</mosaic_0001>

<bundles_post_ra>
// kernel: custom-call.2
= control target key start
LH: loop header
LB: loop body
LE: loop exit
PB: predicated region body
PF: predicated region fallthrough
CT: control target
= control target key end

     0   :  { %s1672_s30 = smov 0   ;;  %s1674_s10 = smov 0   ;;  %s1981_s0 = inlined_call_operand.vmem [shape: f32[16,8,8], index: 0, kind: input, shape index: {}]   ;;  %s1982_s1 = inlined_call_operand.vmem [shape: f32[16,8,8], index: 1, kind: input, shape index: {}]   ;;  %s1983_s2 = inlined_call_operand.vmem [shape: f32[16,8,8], index: 2, kind: input, shape index: {}]   ;;  %s1984_s3 = inlined_call_operand.vmem [shape: f32[16,8,8], index: 3, kind: input, shape index: {}]   ;;  %s1985_s4 = inlined_call_operand.vmem [shape: f32[16,8], index: 4, kind: output, shape index: {0}]   ;;  %s1986_s5 = inlined_call_operand.vmem [shape: f32[16,8], index: 5, kind: output, shape index: {1}]   ;;  %s1987_s6 = inlined_call_operand.vmem [shape: f32[16,8,8], index: 6, kind: output, shape index: {2}]   ;;  %s1988_s7 = inlined_call_operand.vmem [shape: f32[16,8,8], index: 7, kind: output, shape index: {3}]   ;;  %s1989_s8 = inlined_call_operand.vmem [shape: f32[16,8,8], index: 8, kind: output, shape index: {4}]   ;;  %s1990_s9 = inlined_call_operand.vmem [shape: f32[16,8,8], index: 9, kind: output, shape index: {5}]  }
   0x1   :  { %s1676_s11 = smov 0  }
   0x2 LB: > { %s1688_s12 = sadd.s32 4294967295, %s1609_s11   ;;  %s1691_s13 = sadd.s32 1, %s1609_s11   ;;  %s1609_s11 = sphi %s1676_s11, %s1999_s11   ;;  %s1605_s10 = sphi %s1674_s10, %s1998_s10   ;;  %s1601_s30 = sphi %s1672_s30, %s1997_s30  }
   0x3   : > { %s20_s14 = sshrl.u32 %s1609_s11, 3  ;;  %s21_s15 = sshrl.u32 %s1691_s13, 3 }
   0x4   : > { %s22_s16 = ssub.s32 %s20_s14, %s21_s15  ;;  %s25_s17 = sadd.s32 1, %s1605_s10 }
   0x5   : > { %p23_p0 = scmp.eq.s32.totalorder %s22_s16, 0  ;;  %p35_p1 = scmp.ne.s32.totalorder %s1605_s10, %s1601_s30 }
   0x6   : > { %p36_p2 = scmp.eq.s32.totalorder %s1688_s12, 15  ;;  %p1470_p4 = scmp.ge.s32.totalorder %s1609_s11, 16 }
   0x7   : > { %s1700_s18 = scalar_select %p23_p0, %s1605_s10, %s25_s17  }
   0x8   : > { %p1702_p3 = por %p36_p2, %p35_p1  ;;  %86 = sbr.rel (%p1470_p4) target bundleno = 18 (0x12), region = 16 }
   0x9   : > { %1991 = sst [smem:[#allocation23_spill]] %s1700_s18  ;;  %s88_s20 = sand.u32 (!%p1470_p4), 1, %s1609_s11  }
   0xa   : > { %s1472_s21 = sshll.u32 (!%p1470_p4), %s1609_s11, 3  ;;  %s1471_s22 = sshll.u32 (!%p1470_p4), %s88_s20, 3 }
   0xb   : > { %s92_s25 = scalar_lea.vmem (!%p1470_p4), %s1981_s0, %s1472_s21  ;;  %s90_s26 = scalar_lea.vmem (!%p1470_p4), [#allocation0], %s1471_s22 }
   0xc   : > { %s131_s29 = scalar_lea.vmem (!%p1470_p4), %s1982_s1, %s1472_s21  ;;  %s170_s16 = scalar_lea.vmem (!%p1470_p4), %s1983_s2, %s1472_s21 }
   0xd   : > { %v121_v0 = vld [vmem:[%s92_s25] sm:$0xff]  ;;  %s129_s17 = scalar_lea.vmem [#allocation1], %s1471_s22  ;;  %s209_s23 = scalar_lea.vmem %s1984_s3, %s1472_s21 }
   0xe   : > { %122 = vst [vmem:[%s90_s26] sm:$0xff] %v121_v0  ;;  %v160_v1 = vld [vmem:[%s131_s29] sm:$0xff]  ;;  %s168_s24 = scalar_lea.vmem [#allocation2], %s1471_s22  ;;  %s207_s25 = scalar_lea.vmem [#allocation3], %s1471_s22 }
   0xf   : > { %161 = vst [vmem:[%s129_s17] sm:$0xff] %v160_v1  ;;  %v199_v2 = vld [vmem:[%s170_s16] sm:$0xff] }
  0x10   : > { %200 = vst [vmem:[%s168_s24] sm:$0xff] %v199_v2  ;;  %v238_v3 = vld [vmem:[%s209_s23] sm:$0xff] }
  0x11   : > { %239 = vst [vmem:[%s207_s25] sm:$0xff] %v238_v3 }
  0x12 PF: > { %p1479_p5 = scmp.ge.s32.totalorder %s1609_s11, 1  ;;  %p244_p6 = scmp.lt.s32.totalorder %s1609_s11, 17 }
  0x14   : > { %p245_p7 = pnand %p1479_p5, %p244_p6 }
  0x16   : > { %248 = sbr.rel (%p245_p7) target bundleno = 979 (0x3d3), region = 156 }
  0x1b   : > { %s251_s26 = sand.u32 1, %s1688_s12   ;;  %s285_s27 = sand.u32 1, %s1601_s30   ;;  %v329_v4 = vlaneseq  ;;  %v1619_v11 = vmov 0.0  }
  0x1c   : > { %s1480_s28 = sshll.u32 %s251_s26, 3  ;;  %s1725_s18 = sshll.u32 %s285_s27, 3 }
  0x1d   : > { %v1727_v5 = vand.u32 127, %v329_v4  ;;  %v1729_v6 = vshrl.u32 %v329_v4, 7  ;;  %s253_s21 = scalar_lea.vmem [#allocation0], %s1480_s28  ;;  %s257_s22 = scalar_lea.vmem [#allocation1], %s1480_s28 }
  0x1e   : > { %v313_v7 = vld [vmem:[%s253_s21] sm:$0xff]  ;;  %v316_v8 = vld [vmem:[%s257_s22] sm:$0xff]  ;;  %s261_s29 = scalar_lea.vmem [#allocation2], %s1480_s28  ;;  %s265_s11 = scalar_lea.vmem [#allocation3], %s1480_s28 }
  0x1f   : > { %v319_v9 = vld [vmem:[%s261_s29] sm:$0xff]  ;;  %v322_v10 = vld [vmem:[%s265_s11] sm:$0xff]  ;;  %s1731_s14 = scalar_lea.vmem [#allocation6], %s1480_s28  ;;  %s1734_s30 = scalar_lea.vmem [#allocation7], %s1480_s28  ;;  %v331_v5 = vmov %v1727_v5  ;;  %v334_v6 = vmov %v1729_v6  ;;  %vm1359_vm2 = vcmp.lt.s32.totalorder %v1727_v5, 8 }
  0x20   : > { %324 = vst [vmem:[%s1731_s14] sm:$0xff] %v1619_v11  ;;  %325 = vst [vmem:[%s1734_s30] sm:$0xff] %v1619_v11  ;;  %s312_s15 = smov [#allocation10]  ;;  %s315_s16 = smov [#allocation11]  ;;  %v344_v5 = vmov %v1727_v5  ;;  %v347_v6 = vmov %v1729_v6  ;;  %vm338_vm0 = vcmp.eq.s32.totalorder %v334_v6, %v331_v5 }
  0x21   : > { %s1737_s17 = scalar_lea.vmem [#allocation8], %s1480_s28  ;;  %s1740_s20 = scalar_lea.vmem [#allocation9], %s1480_s28  ;;  %314 = vst [vmem:[%s312_s15] sm:$0xff] %v313_v7  ;;  %317 = vst [vmem:[%s315_s16] sm:$0xff] %v316_v8  ;;  %vm351_vm1 = vcmp.eq.s32.totalorder %v347_v6, %v344_v5  ;;  %v1351_v5 = vmov %v1727_v5  ;;  %v1354_v6 = vmov %v1729_v6 }
  0x22   : > { %326 = vst [vmem:[%s1737_s17] sm:$0xff] %v1619_v11  ;;  %327 = vst [vmem:[%s1740_s20] sm:$0xff] %v1619_v11  ;;  %s318_s23 = smov [#allocation12]  ;;  %s321_s24 = smov [#allocation13]  ;;  %vm1364_vm3 = vcmp.eq.s32.totalorder %v1354_v6, %v1351_v5  ;;  %v1402_v5 = vmov %v1727_v5  ;;  %v1371_v6 = vmov %v1729_v6 }
  0x23   : > { %320 = vst [vmem:[%s318_s23] sm:$0xff] %v319_v9  ;;  %323 = vst [vmem:[%s321_s24] sm:$0xff] %v322_v10  ;;  %s328_s14 = smov %s1731_s14  ;;  %s341_s20 = smov %s1740_s20  ;;  %v1368_v5 = vmov %v1727_v5  ;;  %v1405_v6 = vmov %v1729_v6 }
  0x24   : > { %s287_s25 = scalar_lea.vmem [#allocation4], %s1725_s18  ;;  %s1355_s27 = smov [#allocation10]  ;;  %v1385_v5 = vmov %v1727_v5  ;;  %v1388_v6 = vmov %v1729_v6  ;;  %vm1415_vm4 = vcmp.eq.s32.totalorder %v1405_v6, %v1402_v5 }
  0x25   : > { %s1372_s28 = smov [#allocation11]  ;;  %s1389_s21 = smov [#allocation12] }
  0x26   : > { %s1406_s22 = smov [#allocation13] }
  0x27   : > { %v335_v12 = vld [vmem:[%s328_s14] sm:$0xff] }
  0x28   : > { %v339_v13 = vsel %vm338_vm0, 1.0, %v335_v12  ;;  %v1361_v16 = vld [vmem:[%s1355_s27] sm:$0xff] }
  0x29   : > { %v348_v14 = vld [vmem:[%s341_s20] sm:$0xff]  ;;  %340 = vst [vmem:[%s328_s14] sm:$0xff] %v339_v13  ;;  %v1362_v18 = vsel %vm1359_vm2, %v1361_v16, 0.0 }
  0x2a   : > { %v352_v15 = vsel %vm351_vm1, 1.0, %v348_v14  ;;  %v1378_v17 = vld [vmem:[%s1372_s28] sm:$0xff]  ;;  %v1363_v22 = vmul.f32 %v1362_v18, %v1362_v18 }
  0x2b   : > { %353 = vst [vmem:[%s341_s20] sm:$0xff] %v352_v15  ;;  %v1379_v19 = vsel %vm1359_vm2, %v1378_v17, 0.0  ;;  %v1395_v20 = vld [vmem:[%s1389_s21] sm:$0xff] }
  0x2c   : > { %v1412_v21 = vld [vmem:[%s1406_s22] sm:$0xff]  ;;  %v1380_v23 = vmul.f32 %v1379_v19, %v1379_v19  ;;  %v1396_v24 = vsel %vm1359_vm2, %v1395_v20, 0.0  ;;  %v1365_v29 = vsel %vm1364_vm3, 0.0, %v1363_v22 }
  0x2d   : > { %v1413_v25 = vsel %vm1359_vm2, %v1412_v21, 0.0  ;;  %v1397_v26 = vmul.f32 %v1396_v24, %v1396_v24 }
  0x2e   : > { %v1382_v27 = vadd.f32 %v1380_v23, %v1363_v22  ;;  %v1414_v28 = vmul.f32 %v1413_v25, %v1413_v25  ;;  %v1381_v30 = vadd.f32 %v1380_v23, %v1365_v29 }
  0x30   : > { %v1399_v31 = vadd.f32 %v1397_v26, %v1382_v27  ;;  %v1398_v32 = vadd.f32 %v1397_v26, %v1381_v30  ;;  %v1416_v33 = vsel %vm1415_vm4, 0.0, %v1414_v28 }
  0x32   : > { %v1418_v34 = vadd.f32 %v1414_v28, %v1399_v31  ;;  %v1417_v35 = vadd.f32 %v1416_v33, %v1398_v32 }
  0x34   : > { %1419 = vadd.xlane.f32.xlu0 %v1418_v34 }
  0x38   : > { %1427 = vadd.xlane.f32.xlu0 %v1417_v35 }
  0xbd   : > { %v1420_v36 = vpop.xlane.xlu0 %1419 }
  0xbe   : > { %v1421_v37 = vrot.slane %v1420_v36, 4 }
  0xc0   : > { %v1422_v38 = vadd.f32 %v1421_v37, %v1420_v36 }
  0xc1   : > { %v1428_v39 = vpop.xlane.xlu0 %1427 }
  0xc2   : > { %v1423_v40 = vrot.slane %v1422_v38, 2  ;;  %v1429_v41 = vrot.slane %v1428_v39, 4 }
  0xc4   : > { %v1430_v42 = vadd.f32 %v1429_v41, %v1428_v39  ;;  %v1424_v43 = vadd.f32 %v1423_v40, %v1422_v38 }
  0xc6   : > { %v1431_v44 = vrot.slane %v1430_v42, 2  ;;  %v1425_v46 = vrot.slane %v1424_v43, 1 }
  0xc8   : > { %v1432_v45 = vadd.f32 %v1431_v44, %v1430_v42  ;;  %v1426_v49 = vadd.f32 %v1425_v46, %v1424_v43 }
  0xca   : > { %v1433_v47 = vrot.slane %v1432_v45, 1 }
  0xcc   : > { %v1434_v48 = vadd.f32 %v1433_v47, %v1432_v45 }
  0xce   : > { %1520 = vpush %v1434_v48 }
  0xcf   : > { %1522 = vpush %v1426_v49 }
  0xff   : > { %s1521_s29 = spop %1520 }
 0x100   : > { %s1523_s11 = spop %1522 }
 0x101   : > { %s1437_s15 = smul.f32 1e-10, %s1523_s11 }
 0x103   : > { %p1438_p8 = scmp.le.f32.partialorder %s1521_s29, %s1437_s15 }
 0x104   : > { %s1769_s16 = smov (!%p1438_p8), 0  }
 0x105   : > { %1441 = sbr.rel (%p1438_p8) target bundleno = 943 (0x3af), region = 507 }
 0x10a LB: >> { %s1774_s23 = smov 0   ;;  %s1613_s16 = sphi %s1769_s16, %s1993_s16  }
 0x10b LB: >>> { %s458_s24 = smov [#allocation10]  ;;  %v462_v5 = vmov %v1727_v5  ;;  %v465_v6 = vmov %v1729_v6  ;;  %s478_s27 = smov [#allocation11]  ;;  %vm781_vm14 = vcmp.eq.s32.totalorder %v1729_v6, 0  ;;  %vm793_vm15 = vcmp.eq.s32.totalorder %v1729_v6, 7  ;;  %s1617_s23 = sphi %s1774_s23, %s457_s23  }
 0x10c   : >>> { %v482_v5 = vmov %v1727_v5  ;;  %v485_v6 = vmov %v1729_v6  ;;  %v466_v50 = vld [vmem:[%s458_s24] sm:$0xff]  ;;  %vm469_vm5 = vcmp.eq.s32.totalorder %v465_v6, %v462_v5  ;;  %s498_s28 = smov [#allocation13]  ;;  %s459_s21 = smov [#allocation14] }
 0x10d   : >>> { %vm489_vm6 = vcmp.eq.s32.totalorder %v485_v6, %v482_v5  ;;  %v502_v5 = vmov %v1727_v5  ;;  %v505_v6 = vmov %v1729_v6  ;;  %v470_v51 = vsel %vm469_vm5, %v466_v50, 0.0  ;;  %v486_v52 = vld [vmem:[%s478_s27] sm:$0xff]  ;;  %s479_s22 = smov [#allocation15]  ;;  %s499_s29 = smov [#allocation16] }
 0x10e   : >>> { %vm509_vm7 = vcmp.eq.s32.totalorder %v505_v6, %v502_v5  ;;  %v471_v53 = vrot.slane %v470_v51, 4  ;;  %v490_v54 = vsel %vm489_vm6, %v486_v52, 0.0  ;;  %v506_v55 = vld [vmem:[%s498_s28] sm:$0xff]  ;;  %s522_s11 = smov [#allocation15]  ;;  %s520_s15 = smov [#allocation14]  ;;  %v571_v5 = vmov %v1727_v5 }
 0x10f   : >>> { %v491_v56 = vrot.slane %v490_v54, 4  ;;  %v510_v57 = vsel %vm509_vm7, %v506_v55, 0.0  ;;  %s524_s24 = smov [#allocation16]  ;;  %s559_s27 = smov [#allocation17]  ;;  %v574_v6 = vmov %v1729_v6  ;;  %v586_v5 = vmov %v1727_v5 }
 0x110   : >>> { %v472_v58 = vadd.f32 %v471_v53, %v470_v51  ;;  %v511_v59 = vrot.slane %v510_v57, 4  ;;  %s561_s28 = smov [#allocation18]  ;;  %v589_v6 = vmov %v1729_v6  ;;  %vm576_vm12 = vcmp.eq.s32.totalorder %v574_v6, %v571_v5  ;;  %s1796_s14 = smov %s1731_s14 }
 0x111   : >>> { %v492_v60 = vadd.f32 %v491_v56, %v490_v54  ;;  %vm591_vm13 = vcmp.eq.s32.totalorder %v589_v6, %v586_v5  ;;  %s1799_s30 = smov %s1734_s30  ;;  %s1802_s17 = smov %s1737_s17  ;;  %v829_v52 = vld [vmem:[%s1796_s14] sm:$0xff]  ;;  %v684_v5 = vmov %v1727_v5  ;;  %v687_v6 = vmov %v1729_v6 }
 0x112   : >>> { %v473_v61 = vrot.slane %v472_v58, 2  ;;  %v512_v62 = vadd.f32 %v511_v59, %v510_v57  ;;  %s1806_s20 = smov %s1740_s20  ;;  %v830_v53 = vld [vmem:[%s1799_s30] sm:$0xff]  ;;  %s823_s26 = smov [#allocation22]  ;;  %v657_v5 = vmov %v1727_v5  ;;  %v660_v6 = vmov %v1729_v6 }
 0x113   : >>> { %v493_v63 = vrot.slane %v492_v60, 2  ;;  %v831_v56 = vld [vmem:[%s1802_s17] sm:$0xff]  ;;  %v698_v5 = vmov %v1727_v5  ;;  %v701_v6 = vmov %v1729_v6  ;;  %vm691_vm0 = vcmp.eq.s32.totalorder %v687_v6, %v684_v5  ;;  %s457_s23 = sadd.s32 1, %s1617_s23  }
 0x114   : >>> { %v474_v0 = vadd.f32 %v473_v61, %v472_v58  ;;  %v513_v1 = vrot.slane %v512_v62, 2  ;;  %v832_v57 = vld [vmem:[%s1806_s20] sm:$0xff]  ;;  %v671_v5 = vmov %v1727_v5  ;;  %v674_v6 = vmov %v1729_v6  ;;  %p454_p9 = scmp.ge.s32.totalorder %s457_s23, 15  }
 0x115   : >>> { %v494_v2 = vadd.f32 %v493_v63, %v492_v60  ;;  %vm665_vm1 = vcmp.eq.s32.totalorder %v660_v6, %v657_v5  ;;  %vm706_vm3 = vcmp.eq.s32.totalorder %v701_v6, %v698_v5  ;;  %vm678_vm4 = vcmp.eq.s32.totalorder %v674_v6, %v671_v5 }
 0x116   : >>> { %v475_v3 = vrot.slane %v474_v0, 1  ;;  %v514_v4 = vadd.f32 %v513_v1, %v512_v62  ;;  %vm720_vm5 = vcmp.eq.s32.totalorder %v1727_v5, 0  ;;  %vm724_vm6 = vcmp.eq.s32.totalorder %v1727_v5, 1 }
 0x117   : >>> { %v495_v7 = vrot.slane %v494_v2, 1  ;;  %vm737_vm7 = vcmp.eq.s32.totalorder %v1727_v5, 7  ;;  %v358_v5 = vmov (%p454_p9), %v1727_v5  ;;  %v361_v6 = vmov (%p454_p9), %v1729_v6 }
 0x118   : >>> { %v476_v8 = vadd.f32 %v475_v3, %v474_v0  ;;  %v515_v9 = vrot.slane %v514_v4, 1  ;;  %v411_v5 = vmov (%p454_p9), %v1727_v5 }
 0x119   : >>> { %v496_v10 = vadd.f32 %v495_v7, %v494_v2 }
 0x11a   : >>> { %477 = vst [vmem:[%s459_s21] sm:$0x1] %v476_v8  ;;  %v516_v11 = vadd.f32 %v515_v9, %v514_v4  ;;  %s518_s21 = smov [#allocation19] }
 0x11b   : >>> { %497 = vst [vmem:[%s479_s22] sm:$0x1] %v496_v10  ;;  %s519_s22 = smov [#allocation20]  ;;  %s563_s21 = smov %s518_s21 }
 0x11c   : >>> { %517 = vst [vmem:[%s499_s29] sm:$0x1] %v516_v11  ;;  %s565_s22 = smov %s519_s22  ;;  %s567_s29 = smov [#allocation19] }
 0x121   : >>> { %v521_v14 = vld [vmem:[%s520_s15] sm:$0xff]  ;;  %s580_s15 = smov [#allocation21] }
 0x122   : >>> { %v523_v12 = vld [vmem:[%s522_s11] sm:$0xff]  ;;  %v544_v29 = vand.u32 2147483647, %v521_v14  ;;  %s582_s11 = smov [#allocation20] }
 0x123   : >>> { %v527_v13 = vmul.f32 2.0, %v523_v12  ;;  %v525_v15 = vld [vmem:[%s524_s24] sm:$0xff]  ;;  %v545_v32 = vand.u32 2147483647, %v523_v12  ;;  %s597_s24 = smov [#allocation21] }
 0x124   : >>> { %v526_v16 = vsub.f32 %v525_v15, %v521_v14  ;;  %v546_v30 = vand.u32 2147483647, %v525_v15 }
 0x125   : >>> { %1571 = vrcp.f32 %v527_v13 }
 0x126   : >>> { %v547_v31 = vmin.f32 %v544_v29, %v546_v30 }
 0x128   : >>> { %v548_v33 = vmul.f32 1.1920929e-08, %v547_v31 }
 0x12a   : >>> { %vm549_vm11 = vcmp.le.f32.partialorder %v545_v32, %v548_v33 }
 0x132   : >>> { %v1572_v17 = vpop.eup %1571 }
 0x133   : >>> { %v529_v18 = vmul.f32 %v1572_v17, %v526_v16 }
 0x135   : >>> { %v531_v19 = vmul.f32 %v529_v18, %v529_v18  ;;  %vm530_vm10 = vcmp.ge.f32.partialorder %v529_v18, 0.0 }
 0x137   : >>> { %v532_v20 = vadd.f32 1.0, %v531_v19 }
 0x139   : >>> { %1573 = vrsqrt.f32 %v532_v20  ;;  %vm535_vm8 = vcmp.eq.f32.partialorder %v532_v20, inf  ;;  %v538_v22 = vand.u32 2147483648, %v532_v20  ;;  %vm537_vm9 = vcmp.eq.f32.partialorder %v532_v20, 0.0 }
 0x146   : >>> { %v1574_v21 = vpop.eup %1573 }
 0x147   : >>> { %v534_v23 = vmul.f32 %v1574_v21, %v532_v20 }
 0x149   : >>> { %v536_v24 = vsel %vm535_vm8, %v532_v20, %v534_v23  ;;  %vm373_vm8 = vcmp.eq.s32.totalorder (%p454_p9), %v361_v6, %v358_v5  ;;  %v414_v6 = vmov (%p454_p9), %v1729_v6  ;;  %v377_v5 = vmov (%p454_p9), %v1727_v5 }
 0x14a   : >>> { %v539_v25 = vsel %vm537_vm9, %v538_v22, %v536_v24  ;;  %v380_v6 = vmov (%p454_p9), %v1729_v6  ;;  %v394_v5 = vmov (%p454_p9), %v1727_v5  ;;  %vm426_vm9 = vcmp.eq.s32.totalorder (%p454_p9), %v414_v6, %v411_v5 }
 0x14b   : >>> { %v540_v26 = vxor.u32 2147483648, %v539_v25  ;;  %v397_v6 = vmov (%p454_p9), %v1729_v6 }
 0x14d   : >>> { %v541_v27 = vsel %vm530_vm10, %v539_v25, %v540_v26 }
 0x14e   : >>> { %v542_v28 = vadd.f32 %v541_v27, %v529_v18 }
 0x150   : >>> { %1575 = vrcp.f32 %v542_v28 }
 0x15d   : >>> { %v1576_v34 = vpop.eup %1575 }
 0x15e   : >>> { %v550_v35 = vsel %vm549_vm11, 0.0, %v1576_v34 }
 0x15f   : >>> { %v551_v36 = vmul.f32 %v550_v35, %v550_v35  ;;  %v555_v37 = vmul.f32 %v550_v35, %v523_v12 }
 0x161   : >>> { %v552_v38 = vadd.f32 1.0, %v551_v36  ;;  %v556_v39 = vsub.f32 %v521_v14, %v555_v37  ;;  %v558_v40 = vadd.f32 %v555_v37, %v525_v15 }
 0x163   : >>> { %1577 = vrsqrt.f32 %v552_v38  ;;  %560 = vst [vmem:[%s559_s27] sm:$0xff] %v556_v39  ;;  %562 = vst [vmem:[%s561_s28] sm:$0xff] %v558_v40  ;;  %s1789_s27 = smov [#allocation10]  ;;  %s595_s28 = smov [#allocation22] }
 0x164   : >>> { %v605_v49 = vld [vmem:[%s1789_s27] sm:$0xff] }
 0x170   : >>> { %v1578_v41 = vpop.eup %1577 }
 0x171   : >>> { %564 = vst [vmem:[%s563_s21] sm:$0xff] %v1578_v41  ;;  %v554_v42 = vmul.f32 %v1578_v41, %v550_v35  ;;  %s1791_s21 = smov [#allocation11] }
 0x172   : >>> { %v606_v50 = vld [vmem:[%s1791_s21] sm:$0xff] }
 0x173   : >>> { %566 = vst [vmem:[%s565_s22] sm:$0xff] %v554_v42  ;;  %s1793_s22 = smov [#allocation13] }
 0x174   : >>> { %v608_v51 = vld [vmem:[%s1793_s22] sm:$0xff] }
 0x178   : >>> { %v568_v43 = vld [vmem:[%s567_s29] ss:$0 sm:$0xff]  ;;  %s821_s29 = smov [#allocation21] }
 0x179   : >>> { %v577_v44 = vsel %vm576_vm12, %v568_v43, 0.0 }
 0x17a   : >>> { %578 = vadd.xlane.f32.xlu0 %v577_v44  ;;  %v583_v45 = vld [vmem:[%s582_s11] ss:$0 sm:$0xff]  ;;  %s1808_s11 = smov [#allocation12] }
 0x17b   : >>> { %v592_v46 = vsel %vm591_vm13, %v583_v45, 0.0  ;;  %v607_v58 = vld [vmem:[%s1808_s11] sm:$0xff] }
 0x17e   : >>> { %593 = vadd.xlane.f32.xlu0 %v592_v46 }
 0x203   : >>> { %v579_v47 = vpop.xlane.xlu0 %578 }
 0x204   : >>> { %581 = vst [vmem:[%s580_s15] sm:$0xff] %v579_v47  ;;  %s599_s15 = smov [#allocation22] }
 0x207   : >>> { %v594_v48 = vpop.xlane.xlu0 %593 }
 0x208   : >>> { %596 = vst [vmem:[%s595_s28] sm:$0xff] %v594_v48  ;;  %s1835_s28 = smov [#allocation12] }
 0x20b   : >>> { %v598_v54 = vld [vmem:[%s597_s24] sm:$0xff]  ;;  %s627_s24 = smov [#allocation20] }
 0x20c   : >>> { %v822_v55 = vld [vmem:[%s821_s29] sm:$0xff]  ;;  %v609_v59 = vmul.f32 %v605_v49, %v598_v54  ;;  %v612_v60 = vmul.f32 %v606_v50, %v598_v54  ;;  %v619_v61 = vmul.f32 %v608_v51, %v598_v54  ;;  %v616_v4 = vmul.f32 %v607_v58, %v598_v54  ;;  %s654_s29 = smov [#allocation17] }
 0x20d   : >>> { %v833_v62 = vmul.f32 %v829_v52, %v822_v55  ;;  %v836_v63 = vmul.f32 %v830_v53, %v822_v55  ;;  %v840_v0 = vmul.f32 %v831_v56, %v822_v55  ;;  %v843_v1 = vmul.f32 %v832_v57, %v822_v55  ;;  %v628_v24 = vld [vmem:[%s627_s24] ss:$0 sm:$0xff]  ;;  %s694_s24 = smov [#allocation13] }
 0x20e   : >>> { %v661_v55 = vld [vmem:[%s654_s29] ss:$0 sm:$0xff]  ;;  %s710_s29 = smov [#allocation11] }
 0x20f   : >>> { %v600_v2 = vld [vmem:[%s599_s15] sm:$0xff]  ;;  %s681_s15 = smov [#allocation12] }
 0x210   : >>> { %v824_v3 = vld [vmem:[%s823_s26] sm:$0xff]  ;;  %v613_v7 = vmul.f32 %v608_v51, %v600_v2  ;;  %v615_v8 = vmul.f32 %v605_v49, %v600_v2  ;;  %v618_v9 = vmul.f32 %v606_v50, %v600_v2  ;;  %v610_v14 = vmul.f32 %v607_v58, %v600_v2  ;;  %s625_s26 = smov [#allocation19] }
 0x211   : >>> { %v834_v10 = vmul.f32 %v831_v56, %v824_v3  ;;  %v837_v11 = vmul.f32 %v832_v57, %v824_v3  ;;  %v839_v12 = vmul.f32 %v829_v52, %v824_v3  ;;  %v842_v13 = vmul.f32 %v830_v53, %v824_v3  ;;  %v626_v23 = vld [vmem:[%s625_s26] ss:$0 sm:$0xff]  ;;  %s653_s26 = smov [#allocation10] }
 0x212   : >>> { %v614_v15 = vsub.f32 %v612_v60, %v613_v7  ;;  %v620_v16 = vadd.f32 %v619_v61, %v618_v9  ;;  %v617_v18 = vadd.f32 %v616_v4, %v615_v8  ;;  %v611_v22 = vsub.f32 %v609_v59, %v610_v14 }
 0x213   : >>> { %v835_v17 = vsub.f32 %v833_v62, %v834_v10  ;;  %v838_v19 = vsub.f32 %v836_v63, %v837_v11  ;;  %v841_v20 = vadd.f32 %v840_v0, %v839_v12  ;;  %v844_v21 = vadd.f32 %v843_v1, %v842_v13 }
 0x214   : >>> { %622 = vst [vmem:[%s1791_s21] sm:$0xff] %v614_v15  ;;  %624 = vst [vmem:[%s1793_s22] sm:$0xff] %v620_v16  ;;  %s1837_s21 = smov [#allocation13]  ;;  %s1841_s22 = smov [#allocation11] }
 0x215   : >>> { %845 = vst [vmem:[%s1796_s14] sm:$0xff] %v835_v17  ;;  %623 = vst [vmem:[%s1808_s11] sm:$0xff] %v617_v18  ;;  %s849_s14 = smov %s1731_s14  ;;  %s695_s11 = smov [#allocation18] }
 0x216   : >>> { %846 = vst [vmem:[%s1799_s30] sm:$0xff] %v838_v19  ;;  %847 = vst [vmem:[%s1802_s17] sm:$0xff] %v841_v20  ;;  %s850_s17 = smov %s1737_s17  ;;  %s1828_s30 = smov %s1734_s30  ;;  %v702_v56 = vld [vmem:[%s695_s11] ss:$0 sm:$0xff] }
 0x217   : >>> { %848 = vst [vmem:[%s1806_s20] sm:$0xff] %v844_v21  ;;  %621 = vst [vmem:[%s1789_s27] sm:$0xff] %v611_v22  ;;  %s1831_s20 = smov %s1740_s20  ;;  %s1839_s27 = smov [#allocation10] }
 0x218   : >>> { %s1621_s11 = smov 127  }
 0x21b   : >>> { %v636_v39 = vld [vmem:[%s1837_s21] sm:$0xff] }
 0x21c   : >>> { %v851_v25 = vld [vmem:[%s849_s14] ss:$0 sm:$0xff]  ;;  %v1499_v27 = vld [vmem:[%s849_s14 + $0x7] ss:$0 sm:$0xff]  ;;  %v644_v42 = vmul.f32 %v636_v39, %v628_v24  ;;  %v647_v46 = vmul.f32 %v636_v39, %v626_v23 }
 0x21d   : >>> { %v1498_v26 = vld [vmem:[%s849_s14 - $0x1] sm:$0xfe]  ;;  %v1503_v34 = vld [vmem:[%s1828_s30 + $0x7] ss:$0 sm:$0xff] }
 0x21e   : >>> { %v858_v28 = vsel %vm781_vm14, %v851_v25, %v1498_v26  ;;  %v862_v29 = vld [vmem:[%s850_s17] ss:$0 sm:$0xff]  ;;  %v1501_v30 = vld [vmem:[%s850_s17 + $0x1] sm:$0x7f] }
 0x21f   : >>> { %v875_v31 = vld [vmem:[%s1828_s30] ss:$0 sm:$0xff]  ;;  %861 = vst [vmem:[%s849_s14] sm:$0xff] %v858_v28  ;;  %v870_v32 = vsel %vm793_vm15, %v1499_v27, %v1501_v30  ;;  %v1505_v37 = vld [vmem:[%s1831_s20 + $0x1] sm:$0x7f] }
 0x220   : >>> { %v1502_v33 = vld [vmem:[%s1828_s30 - $0x1] sm:$0xfe]  ;;  %1500 = vst [vmem:[%s849_s14 + $0x1] sm:$0x1] %v862_v29  ;;  %872 = vst [vmem:[%s850_s17] sm:$0xff] %v870_v32  ;;  %v894_v40 = vsel %vm793_vm15, %v1503_v34, %v1505_v37 }
 0x221   : >>> { %v886_v35 = vld [vmem:[%s1831_s20] ss:$0 sm:$0xff]  ;;  %v882_v36 = vsel %vm781_vm14, %v875_v31, %v1502_v33 }
 0x222   : >>> { %v635_v38 = vld [vmem:[%s1835_s28] sm:$0xff]  ;;  %885 = vst [vmem:[%s1828_s30] sm:$0xff] %v882_v36  ;;  %896 = vst [vmem:[%s1831_s20] sm:$0xff] %v894_v40 }
 0x223   : >>> { %v643_v41 = vmul.f32 %v635_v38, %v626_v23  ;;  %v646_v43 = vmul.f32 %v635_v38, %v628_v24  ;;  %v633_v44 = vld [vmem:[%s1839_s27] sm:$0xff]  ;;  %1504 = vst [vmem:[%s1828_s30 + $0x1] sm:$0x1] %v886_v35 }
 0x224   : >>> { %v634_v45 = vld [vmem:[%s1841_s22] sm:$0xff]  ;;  %v637_v47 = vmul.f32 %v633_v44, %v626_v23  ;;  %v640_v49 = vmul.f32 %v633_v44, %v628_v24 }
 0x225   : >>> { %v638_v48 = vmul.f32 %v634_v45, %v628_v24  ;;  %v645_v50 = vsub.f32 %v643_v41, %v644_v42  ;;  %v641_v51 = vmul.f32 %v634_v45, %v626_v23  ;;  %v648_v52 = vadd.f32 %v647_v46, %v646_v43 }
 0x227   : >>> { %v639_v53 = vsub.f32 %v637_v47, %v638_v48  ;;  %651 = vst [vmem:[%s1835_s28] sm:$0xff] %v645_v50  ;;  %v642_v54 = vadd.f32 %v641_v51, %v640_v49  ;;  %652 = vst [vmem:[%s1837_s21] sm:$0xff] %v648_v52  ;;  %s668_s28 = smov [#allocation11]  ;;  %s1875_s21 = smov [#allocation12] }
 0x229   : >>> { %649 = vst [vmem:[%s1839_s27] sm:$0xff] %v639_v53  ;;  %650 = vst [vmem:[%s1841_s22] sm:$0xff] %v642_v54  ;;  %s709_s27 = smov [#allocation10]  ;;  %s1620_s22 = smov 1  }
 0x22e   : >>> { %v688_v57 = vld [vmem:[%s681_s15] sm:$0xff] }
 0x22f   : >>> { %v692_v58 = vsel %vm691_vm0, 0.0, %v688_v57  ;;  %v703_v60 = vld [vmem:[%s694_s24] sm:$0xff] }
 0x230   : >>> { %v662_v59 = vld [vmem:[%s653_s26] sm:$0xff]  ;;  %693 = vst [vmem:[%s681_s15] sm:$0xff] %v692_v58  ;;  %v707_v63 = vsel %vm706_vm3, %v702_v56, %v703_v60  ;;  %s1878_s15 = smov [#allocation13] }
 0x231   : >>> { %v666_v61 = vsel %vm665_vm1, %v661_v55, %v662_v59  ;;  %v675_v62 = vld [vmem:[%s668_s28] sm:$0xff]  ;;  %708 = vst [vmem:[%s694_s24] sm:$0xff] %v707_v63  ;;  %s797_s24 = smov [#allocation11] }
 0x232   : >>> { %667 = vst [vmem:[%s653_s26] sm:$0xff] %v666_v61  ;;  %v679_v0 = vsel %vm678_vm4, 0.0, %v675_v62  ;;  %s773_s26 = smov [#allocation10] }
 0x233   : >>> { %680 = vst [vmem:[%s668_s28] sm:$0xff] %v679_v0  ;;  %s774_s28 = smov [#allocation12] }
 0x237   : >>> { %v747_v1 = vld [vmem:[%s1875_s21] sm:$0xff] }
 0x238   : >>> { %748 = vrot.lane.b32.xlu0 %v747_v1, %s1620_s22  ;;  %v743_v4 = vld [vmem:[%s1878_s15] sm:$0xff] }
 0x239   : >>> { %v715_v2 = vld [vmem:[%s709_s27] sm:$0xff] }
 0x23a   : >>> { %716 = vrot.lane.b32.xlu1 %v715_v2, %s1620_s22  ;;  %v711_v3 = vld [vmem:[%s710_s29] sm:$0xff] }
 0x23e   : >>> { %712 = vrot.lane.b32.xlu1 %v711_v3, %s1620_s22 }
 0x242   : >>> { %733 = vrot.lane.b32.xlu1 %v711_v3, %s1621_s11 }
 0x246   : >>> { %744 = vrot.lane.b32.xlu1 %v743_v4, %s1620_s22  ;;  %s362_s22 = smov (%p454_p9), [#allocation10] }
 0x24a   : >>> { %765 = vrot.lane.b32.xlu1 %v743_v4, %s1621_s11  ;;  %s398_s11 = smov (%p454_p9), [#allocation12] }
 0x2aa   : >>> { %v749_v13 = vpop.permute.xlu0 %748 }
 0x2ab   : >>> { %v753_v15 = vsel %vm720_vm5, %v747_v1, %v749_v13 }
 0x2ac   : >>> { %v717_v7 = vpop.permute.xlu1 %716 }
 0x2ad   : >>> { %v721_v8 = vsel %vm720_vm5, %v715_v2, %v717_v7 }
 0x2b0   : >>> { %v713_v9 = vpop.permute.xlu1 %712 }
 0x2b1   : >>> { %v725_v10 = vsel %vm724_vm6, %v713_v9, %v721_v8 }
 0x2b2   : >>> { %v731_v11 = vsel %vm1359_vm2, %v725_v10, 0.0 }
 0x2b3   : >>> { %739 = vst [vmem:[%s709_s27] sm:$0xff] %v731_v11  ;;  %s798_s27 = smov [#allocation13] }
 0x2b4   : >>> { %v734_v12 = vpop.permute.xlu1 %733 }
 0x2b5   : >>> { %v738_v14 = vsel %vm737_vm7, %v715_v2, %v734_v12 }
 0x2b6   : >>> { %740 = vst [vmem:[%s710_s29] sm:$0xff] %v738_v14  ;;  %s381_s29 = smov (%p454_p9), [#allocation11] }
 0x2b8   : >>> { %v745_v16 = vpop.permute.xlu1 %744 }
 0x2b9   : >>> { %v757_v17 = vsel %vm724_vm6, %v745_v16, %v753_v15 }
 0x2ba   : >>> { %v775_v18 = vld [vmem:[%s773_s26] ss:$0 sm:$0xff]  ;;  %v1491_v20 = vld [vmem:[%s773_s26 + $0x7] ss:$0 sm:$0xff]  ;;  %v763_v22 = vsel %vm1359_vm2, %v757_v17, 0.0 }
 0x2bb   : >>> { %v1490_v19 = vld [vmem:[%s773_s26 - $0x1] sm:$0xfe]  ;;  %771 = vst [vmem:[%s1875_s21] sm:$0xff] %v763_v22  ;;  %s897_s21 = sadd.s32 (%p454_p9), 1, %s1613_s16  }
 0x2bc   : >>> { %v782_v21 = vsel %vm781_vm14, %v775_v18, %v1490_v19  ;;  %v766_v23 = vpop.permute.xlu1 %765  ;;  %p450_p10 = scmp.ge.s32.totalorder (%p454_p9), %s897_s21, 15  ;;  %s1993_s16 = smov (%p454_p9), %s897_s21 }
 0x2bd   : >>> { %785 = vst [vmem:[%s773_s26] sm:$0xff] %v782_v21  ;;  %v799_v24 = vld [vmem:[%s797_s24] ss:$0 sm:$0xff]  ;;  %v1495_v26 = vld [vmem:[%s797_s24 + $0x7] ss:$0 sm:$0xff]  ;;  %v770_v27 = vsel %vm737_vm7, %v747_v1, %v766_v23 }
 0x2be   : >>> { %v1494_v25 = vld [vmem:[%s797_s24 - $0x1] sm:$0xfe]  ;;  %772 = vst [vmem:[%s1878_s15] sm:$0xff] %v770_v27  ;;  %s415_s15 = smov (%p454_p9), [#allocation13] }
 0x2bf   : >>> { %v806_v28 = vsel %vm781_vm14, %v799_v24, %v1494_v25 }
 0x2c0   : >>> { %809 = vst [vmem:[%s797_s24] sm:$0xff] %v806_v28 }
 0x2c2   : >>> { %v786_v29 = vld [vmem:[%s774_s28] ss:$0 sm:$0xff]  ;;  %v1493_v30 = vld [vmem:[%s774_s28 + $0x1] sm:$0x7f] }
 0x2c3   : >>> { %1492 = vst [vmem:[%s773_s26 + $0x1] sm:$0x1] %v786_v29  ;;  %v794_v31 = vsel %vm793_vm15, %v1491_v20, %v1493_v30 }
 0x2c4   : >>> { %796 = vst [vmem:[%s774_s28] sm:$0xff] %v794_v31 }
 0x2c5   : >>> { %v810_v32 = vld [vmem:[%s798_s27] ss:$0 sm:$0xff]  ;;  %v1497_v33 = vld [vmem:[%s798_s27 + $0x1] sm:$0x7f] }
 0x2c6   : >>> { %1496 = vst [vmem:[%s797_s24 + $0x1] sm:$0x1] %v810_v32  ;;  %v818_v34 = vsel %vm793_vm15, %v1495_v26, %v1497_v33 }
 0x2c7   : >>> { %820 = vst [vmem:[%s798_s27] sm:$0xff] %v818_v34  ;;  %456 = sbr.rel (!%p454_p9) target bundleno = 267 (0x10b), region = 502 }
 0x2ca   : >> { %v368_v35 = vld [vmem:[%s362_s22] sm:$0xff] (%p454_p9) }
 0x2cb   : >> { %v369_v37 = vsel (%p454_p9), %vm1359_vm2, %v368_v35, 0.0  ;;  %v404_v39 = vld [vmem:[%s398_s11] sm:$0xff] (%p454_p9) }
 0x2cc   : >> { %v370_v41 = vmul.f32 %v369_v37, %v369_v37  ;;  %v405_v43 = vsel %vm1359_vm2, %v404_v39, 0.0 }
 0x2cd   : >> { %v387_v36 = vld [vmem:[%s381_s29] sm:$0xff]  ;;  %v406_v45 = vmul.f32 %v405_v43, %v405_v43 }
 0x2ce   : >> { %v388_v38 = vsel %vm1359_vm2, %v387_v36, 0.0  ;;  %v421_v40 = vld [vmem:[%s415_s15] sm:$0xff]  ;;  %v374_v48 = vsel %vm373_vm8, 0.0, %v370_v41 }
 0x2cf   : >> { %v389_v42 = vmul.f32 %v388_v38, %v388_v38  ;;  %v422_v44 = vsel %vm1359_vm2, %v421_v40, 0.0 }
 0x2d0   : >> { %v423_v47 = vmul.f32 %v422_v44, %v422_v44 }
 0x2d1   : >> { %v391_v46 = vadd.f32 %v389_v42, %v370_v41  ;;  %v390_v49 = vadd.f32 %v389_v42, %v374_v48 }
 0x2d2   : >> { %v427_v52 = vsel %vm426_vm9, 0.0, %v423_v47 }
 0x2d3   : >> { %v408_v50 = vadd.f32 %v406_v45, %v391_v46  ;;  %v407_v51 = vadd.f32 %v406_v45, %v390_v49 }
 0x2d5   : >> { %v429_v53 = vadd.f32 %v423_v47, %v408_v50  ;;  %v428_v54 = vadd.f32 %v427_v52, %v407_v51 }
 0x2d7   : >> { %430 = vadd.xlane.f32.xlu0 %v429_v53 }
 0x2db   : >> { %438 = vadd.xlane.f32.xlu0 %v428_v54 }
 0x360   : >> { %v431_v55 = vpop.xlane.xlu0 %430 }
 0x361   : >> { %v432_v56 = vrot.slane %v431_v55, 4 }
 0x363   : >> { %v433_v57 = vadd.f32 %v432_v56, %v431_v55 }
 0x364   : >> { %v439_v58 = vpop.xlane.xlu0 %438 }
 0x365   : >> { %v434_v59 = vrot.slane %v433_v57, 2  ;;  %v440_v60 = vrot.slane %v439_v58, 4 }
 0x367   : >> { %v441_v61 = vadd.f32 %v440_v60, %v439_v58  ;;  %v435_v62 = vadd.f32 %v434_v59, %v433_v57 }
 0x369   : >> { %v442_v63 = vrot.slane %v441_v61, 2  ;;  %v436_v1 = vrot.slane %v435_v62, 1 }
 0x36b   : >> { %v443_v0 = vadd.f32 %v442_v63, %v441_v61  ;;  %v437_v4 = vadd.f32 %v436_v1, %v435_v62 }
 0x36d   : >> { %v444_v2 = vrot.slane %v443_v0, 1 }
 0x36f   : >> { %v445_v3 = vadd.f32 %v444_v2, %v443_v0 }
 0x371   : >> { %1524 = vpush %v445_v3 }
 0x372   : >> { %1526 = vpush %v437_v4 }
 0x3a2   : >> { %s1525_s23 = spop %1524 }
 0x3a3   : >> { %s1527_s26 = spop %1526 }
 0x3a4   : >> { %s448_s24 = smul.f32 1e-10, %s1527_s26 }
 0x3a6   : >> { %p449_p11 = scmp.le.f32.partialorder %s1525_s23, %s448_s24 }
 0x3a8   : >> { %p451_p12 = por %p450_p10, %p449_p11 }
 0x3aa   : > { %899 = sbr.rel (!%p451_p12) target bundleno = 266 (0x10a), region = 513 }
 0x3af PF: > { %s904_s28 = smov [#allocation10]  ;;  %v908_v5 = vmov %v1727_v5  ;;  %v911_v6 = vmov %v1729_v6  ;;  %s924_s16 = smov [#allocation13] }
 0x3b0   : > { %v928_v5 = vmov %v1727_v5  ;;  %v931_v6 = vmov %v1729_v6  ;;  %v912_v7 = vld [vmem:[%s904_s28] sm:$0xff]  ;;  %vm915_vm10 = vcmp.eq.s32.totalorder %v911_v6, %v908_v5  ;;  %s900_s27 = sand.u32 7, %s1688_s12   ;;  %s1994_s22 = scalar_lea.vmem [#allocation5], %s1725_s18 }
 0x3b1   : > { %vm935_vm11 = vcmp.eq.s32.totalorder %v931_v6, %v928_v5  ;;  %v916_v8 = vsel %vm915_vm10, %v912_v7, 0.0  ;;  %v932_v10 = vld [vmem:[%s924_s16] sm:$0xff]  ;;  %s901_s21 = scalar_lea.vmem %s287_s25, %s900_s27 [#allocation4]  ;;  %s903_s29 = scalar_lea.vmem %s1994_s22, %s900_s27 [#allocation5] }
 0x3b2   : > { %v917_v9 = vrot.slane %v916_v8, 4  ;;  %v936_v11 = vsel %vm935_vm11, %v932_v10, 0.0  ;;  %s905_s21 = smov %s901_s21  ;;  %s925_s29 = smov %s903_s29 }
 0x3b3   : > { %v937_v13 = vrot.slane %v936_v11, 4  ;;  %s971_s11 = sshrl.u32 (%p1702_p3), %s1688_s12, 3 }
 0x3b4   : > { %v918_v12 = vadd.f32 %v917_v9, %v916_v8  ;;  %s1512_s15 = sshll.u32 (%p1702_p3), %s971_s11, 3 }
 0x3b5   : > { %v938_v15 = vadd.f32 %v937_v13, %v936_v11  ;;  %s973_s24 = scalar_lea.vmem (%p1702_p3), %s1985_s4, %s1512_s15 }
 0x3b6   : > { %v919_v14 = vrot.slane %v918_v12, 2 }
 0x3b7   : > { %v939_v17 = vrot.slane %v938_v15, 2 }
 0x3b8   : > { %v920_v16 = vadd.f32 %v919_v14, %v918_v12 }
 0x3b9   : > { %v940_v19 = vadd.f32 %v939_v17, %v938_v15 }
 0x3ba   : > { %v921_v18 = vrot.slane %v920_v16, 1 }
 0x3bb   : > { %v941_v6 = vrot.slane %v940_v19, 1  ;;  %970 = sbr.rel (!%p1702_p3) target bundleno = 967 (0x3c7), region = 174 }
 0x3bc   : > { %v922_v5 = vadd.f32 %v921_v18, %v920_v16 }
 0x3bd   : > { %v942_v20 = vadd.f32 %v941_v6, %v940_v19 }
 0x3be   : > { %923 = vst [vmem:[%s905_s21] sm:$0x1] %v922_v5 }
 0x3bf   : > { %943 = vst [vmem:[%s925_s29] sm:$0x1] %v942_v20 }
 0x3c5   : > { %v1002_v21 = vld [vmem:[%s287_s25] sm:$0xff] }
 0x3c6   : > { %1003 = vst [vmem:[%s973_s24] sm:$0xff] %v1002_v21 }
 0x3c7 PF: > { %1009 = sbr.rel (!%p1702_p3) target bundleno = 975 (0x3cf), region = 212  ;;  %s1010_s28 = sshrl.u32 (%p1702_p3), %s1688_s12, 3 }
 0x3c8   : > { %s1995_s16 = scalar_lea.vmem (%p1702_p3), [#allocation5], %s1725_s18  ;;  %s1513_s27 = sshll.u32 (%p1702_p3), %s1010_s28, 3 }
 0x3c9   : > { %s1012_s25 = scalar_lea.vmem (%p1702_p3), %s1986_s5, %s1513_s27 }
 0x3cd   : > { %v1041_v22 = vld [vmem:[%s1995_s16] sm:$0xff] }
 0x3ce   : > { %1042 = vst [vmem:[%s1012_s25] sm:$0xff] %v1041_v22 }
 0x3cf PF: > { %s1514_s29 = sshll.u32 %s1688_s12, 3  ;;  %v1076_v23 = vld [vmem:[%s1731_s14] sm:$0xff]  ;;  %v1111_v24 = vld [vmem:[%s1734_s30] sm:$0xff] }
 0x3d0   : > { %v1146_v25 = vld [vmem:[%s1737_s17] sm:$0xff]  ;;  %s1047_s18 = scalar_lea.vmem %s1987_s6, %s1514_s29  ;;  %s1082_s26 = scalar_lea.vmem %s1988_s7, %s1514_s29  ;;  %v1181_v26 = vld [vmem:[%s1740_s20] sm:$0xff] }
 0x3d1   : > { %1077 = vst [vmem:[%s1047_s18] sm:$0xff] %v1076_v23  ;;  %1112 = vst [vmem:[%s1082_s26] sm:$0xff] %v1111_v24  ;;  %s1117_s16 = scalar_lea.vmem %s1989_s8, %s1514_s29  ;;  %s1152_s14 = scalar_lea.vmem %s1990_s9, %s1514_s29 }
 0x3d2   : > { %1147 = vst [vmem:[%s1117_s16] sm:$0xff] %v1146_v25  ;;  %1182 = vst [vmem:[%s1152_s14] sm:$0xff] %v1181_v26 }
 0x3d3 PF: > { %s1996_s17 = sld [smem:[#allocation23_spill]]  ;;  %p13_p13 = scmp.ge.s32.totalorder %s1691_s13, 18  }
 0x3d4   : > { %s1997_s30 = smov %s1605_s10  ;;  %s1999_s11 = smov %s1691_s13 }
 0x3d5   :  { %15 = sbr.rel (!%p13_p13) target bundleno = 2 (0x2), region = 524 }
 0x3d9   : > { %s1998_s10 = smov %s1996_s17 }

// kernel: gsr_layer_batched.1
= control target key start
LH: loop header
LB: loop body
LE: loop exit
PB: predicated region body
PF: predicated region fallthrough
CT: control target
= control target key end

     0   :  { %s3037_s15 = smov 0   ;;  %s3039_s16 = smov 0   ;;  %s3666_s0 = inlined_call_operand.vmem [shape: f32[32,16], index: 0, kind: input, shape index: {}]   ;;  %s3667_s1 = inlined_call_operand.vmem [shape: f32[16,256], index: 1, kind: input, shape index: {}]   ;;  %s3668_s2 = inlined_call_operand.vmem [shape: f32[16,16,32], index: 2, kind: input, shape index: {}]   ;;  %s3669_s3 = inlined_call_operand.vmem [shape: f32[32,512], index: 3, kind: output, shape index: {0}]   ;;  %s3670_s4 = inlined_call_operand.vmem [shape: f32[32,512], index: 4, kind: output, shape index: {1}]  }
   0x1   :  { %s3041_s17 = smov 0  }
   0x2 LB: > { %s3050_s18 = sadd.s32 4294967295, %s3003_s17   ;;  %s3052_s19 = sadd.s32 1, %s3003_s17   ;;  %s3003_s17 = sphi %s3041_s17, %s3682_s17   ;;  %s2999_s16 = sphi %s3039_s16, %s3681_s16   ;;  %s2995_s15 = sphi %s3037_s15, %s3680_s15  }
   0x3   : > { %s40_s20 = ssub.s32 %s3003_s17, %s3052_s19  ;;  %s43_s21 = sadd.s32 1, %s2999_s16 }
   0x4   : > { %p41_p0 = scmp.eq.s32.totalorder %s40_s20, 0  ;;  %p50_p1 = scmp.ne.s32.totalorder %s2999_s16, %s2995_s15 }
   0x5   : > { %p51_p2 = scmp.eq.s32.totalorder %s3003_s17, 0  ;;  %p106_p3 = scmp.eq.s32.totalorder %s3050_s18, 1 }
   0x6   : > { %s3060_s22 = scalar_select %p41_p0, %s2999_s16, %s43_s21  }
   0x7   : > { %p52_p4 = por %p51_p2, %p50_p1  ;;  %p3062_p5 = por %p106_p3, %p50_p1 }
   0x8   : > { %p2495_p6 = scmp.ge.s32.totalorder %s3003_s17, 2 }
   0xa   : > { %157 = sbr.rel (%p2495_p6) target bundleno = 20 (0x14), region = 20 }
   0xf   : > { %160 = sbr.rel (!%p52_p4) target bundleno = 20 (0x14), region = 24  ;;  %s162_s24 = sand.u32 (%p52_p4), 1, %s2999_s16  }
  0x10   : > { %s2497_s25 = sshll.u32 (%p52_p4), %s3003_s17, 3  ;;  %s2496_s26 = sshll.u32 (%p52_p4), %s162_s24, 4 }
  0x11   : > { %s166_s29 = scalar_lea.vmem (%p52_p4), %s3667_s1, %s2497_s25  ;;  %s164_s30 = scalar_lea.vmem (%p52_p4), [#allocation2], %s2496_s26 }
  0x12   : > { %v197_v0 = vld [vmem:[%s166_s29] sm:$0xff] (%p52_p4)  ;;  %v199_v1 = vld [vmem:[%s166_s29 + $0x10] sm:$0xff] (%p52_p4) }
  0x13   : > { %198 = vst [vmem:[%s164_s30] sm:$0xff] (%p52_p4), %v197_v0  ;;  %200 = vst [vmem:[%s164_s30 + $0x8] sm:$0xff] (%p52_p4), %v199_v1 }
  0x14 PF: > { %p2498_p7 = scmp.ge.s32.totalorder %s3003_s17, 1  ;;  %p215_p8 = scmp.lt.s32.totalorder %s3003_s17, 3 }
  0x16   : > { %p216_p9 = pnand %p2498_p7, %p215_p8 }
  0x17   : > { %s222_s5 = sand.u32 (!%p216_p9), 1, %s2995_s15   ;;  %s2502_s20 = sshll.u32 (!%p216_p9), %s3050_s18, 3 }
  0x18   : > { %219 = sbr.rel (%p216_p9) target bundleno = 1561 (0x619), region = 66  ;;  %s2499_s8 = sshll.u32 (!%p216_p9), %s222_s5, 4 }
  0x19   : > { %s224_s9 = scalar_lea.vmem (!%p216_p9), [#allocation2], %s2499_s8  ;;  %p257_p10 = scmp.lt.s32.totalorder (!%p216_p9), %s2502_s20, 15 }
  0x1a   : > { %s3005_s27 = smov (!%p216_p9), 112   ;;  %s3006_s28 = smov (!%p216_p9), 96  }
  0x1b   : > { %s3007_s29 = smov (!%p216_p9), 80   ;;  %s3008_s30 = smov (!%p216_p9), 64  }
  0x1c   : > { %s3009_s6 = smov (!%p216_p9), 48   ;;  %s3010_s7 = smov (!%p216_p9), 32  }
  0x1d   : > { %v265_v2 = vld [vmem:[%s3666_s0] sm:$0xff]  ;;  %vm271_vm0 = vcmask 130048   ;;  %v270_v3 = vld [vmem:[%s224_s9 + $0x8] sm:$0xff]  ;;  %v267_v6 = vld [vmem:[%s3666_s0 + $0x10] sm:$0xff]  ;;  %s3684_s20 = smov (!%p257_p10, %s2502_s20), 15  ;;  %s3011_s8 = smov 16   ;;  %v369_v20 = vlaneseq }
  0x1e   : > { %2752 = vmatprep.mubr.msk.f32.mxu0 %vm271_vm0, %v265_v2  ;;  %v269_v4 = vld [vmem:[%s224_s9] sm:$0xff]  ;;  %2748 = vmatprep.subr.mxu0 %v270_v3  ;;  %v266_v5 = vld [vmem:[%s3666_s0 + $0x8] sm:$0xff]  ;;  %v268_v7 = vld [vmem:[%s3666_s0 + $0x18] sm:$0xff]  ;;  %s2627_s21 = sshll.u32 %s3684_s20, 4  ;;  %vm487_vm2 = vcmask 261120   ;;  %s3347_s9 = sshll.u32 %s222_s5, 6 }
  0x1f   : > { %2749 = vmatpush3.msra.mxu0 %v270_v3  ;;  %s3093_s26 = scalar_lea.vmem %s3668_s2, %s2627_s21  ;;  %v370_v21 = vshrl.u32 %v369_v20, 7  ;;  %v375_v22 = vand.u32 127, %v369_v20  ;;  %vm2156_vm6 = vcmask 523264   ;;  %vm2161_vm7 = vcmask 785408   ;;  %s3381_s15 = scalar_lea.vmem [#allocation3], %s3347_s9 }
  0x20   : > { %2750 = vmatprep.subr.mxu0 %v269_v4  ;;  %v381_v8 = vld [vmem:[%s3093_s26 + $0x8] sm:$0xff]  ;;  %v380_v9 = vld [vmem:[%s3093_s26] sm:$0xff]  ;;  %v2522_v10 = vld [vmem:[%s3093_s26 + $0x18] sm:$0xff]  ;;  %s3485_s5 = scalar_lea.vmem [#allocation4], %s3347_s9  ;;  %s2628_s10 = sshll.u32 (%p3062_p5), %s3050_s18, 4 }
  0x21   : > { %2751 = vmatpush3.msra.mxu0 %v269_v4  ;;  %2758 = vmatprep.subr.mxu1 %v381_v8  ;;  %v2521_v13 = vld [vmem:[%s3093_s26 + $0x10] sm:$0xff]  ;;  %v373_v24 = vadd.s32 24, %v370_v21  ;;  %vm3119_vm1 = vcmp.eq.s32.totalorder %v370_v21, %v375_v22  ;;  %v372_v28 = vadd.s32 16, %v370_v21  ;;  %v371_v33 = vadd.s32 8, %v370_v21  ;;  %v2536_v42 = vld [vmem:[%s3093_s26 + $0x28] sm:$0xff]  ;;  %v2535_v45 = vld [vmem:[%s3093_s26 + $0x20] sm:$0xff]  ;;  %s2327_s13 = scalar_lea.vmem (%p3062_p5), %s3669_s3, %s2628_s10 }
  0x22   : > { %2753 = vmatmul.mubr.msk.f32.vlgmr.msra.gmra.mxu0 %vm271_vm0, %v266_v5  ;;  %2759 = vmatpush3.msra.mxu1 %v381_v8  ;;  %v2550_v62 = vld [vmem:[%s3093_s26 + $0x38] sm:$0xff]  ;;  %v2549_v63 = vld [vmem:[%s3093_s26 + $0x30] sm:$0xff]  ;;  %v2563_v21 = vld [vmem:[%s3093_s26 + $0x40] sm:$0xff] }
  0x23   : > { %2755 = vmatprep.mubr.msk.f32.mxu0 %vm271_vm0, %v267_v6  ;;  %2760 = vmatprep.subr.mxu1 %v380_v9  ;;  %vm3127_vm3 = vcmp.eq.s32.totalorder %v373_v24, %v375_v22  ;;  %vm3133_vm4 = vcmp.eq.s32.totalorder %v372_v28, %v375_v22  ;;  %vm3149_vm5 = vcmp.eq.s32.totalorder %v371_v33, %v375_v22 }
  0x24   : > { %2761 = vmatpush3.msra.mxu1 %v380_v9 }
  0x25   : > { %2782 = vmatprep.subr.mxu1 %v2522_v10 }
  0x26   : > { %2756 = vmatmul.mubr.msk.f32.gmra.mxu0 %vm271_vm0, %v268_v7 }
  0xe2   : > { %v2754_v11 = vpop.f32.mrf.mxu0 }
  0xe4   : > { %v350_v12 = vpop.f32.mrf.mxu0 }
  0xe5   : > { %592 = vrot.lane.b32.xlu0 %v350_v12, %s3005_s27  ;;  %2762 = vmatprep.mubr.msk.f32.mxu1 %vm271_vm0, %v350_v12 }
  0xe6   : > { %v2757_v14 = vpop.f32.mrf.mxu0  ;;  %2763 = vmatmul.mubr.msk.f32.vlgmr.msra.gmra.mxu1 %vm271_vm0, %v2754_v11 }
  0xe7   : > { %2783 = vmatpush3.msra.mxu1 %v2522_v10 }
  0xe8   : > { %v360_v15 = vpop.f32.mrf.mxu0  ;;  %2784 = vmatprep.subr.mxu1 %v2521_v13 }
  0xe9   : > { %594 = vrot.lane.b32.xlu0 %v2754_v11, %s3005_s27  ;;  %596 = vrot.lane.b32.xlu1 %v360_v15, %s3005_s27 }
  0xea   : > { %2765 = vmatprep.mubr.msk.f32.mxu1 %vm271_vm0, %v360_v15  ;;  %2785 = vmatpush3.msra.mxu1 %v2521_v13 }
  0xeb   : > { %2766 = vmatmul.mubr.msk.f32.gmra.mxu1 %vm271_vm0, %v2757_v14 }
  0xed   : > { %805 = vrot.lane.b32.xlu0 %v350_v12, %s3006_s28  ;;  %598 = vrot.lane.b32.xlu1 %v2757_v14, %s3005_s27 }
  0xf1   : > { %1018 = vrot.lane.b32.xlu0 %v350_v12, %s3007_s29  ;;  %807 = vrot.lane.b32.xlu1 %v2754_v11, %s3006_s28 }
  0xf5   : > { %809 = vrot.lane.b32.xlu0 %v360_v15, %s3006_s28  ;;  %1020 = vrot.lane.b32.xlu1 %v2754_v11, %s3007_s29 }
  0xf9   : > { %1022 = vrot.lane.b32.xlu0 %v360_v15, %s3007_s29  ;;  %811 = vrot.lane.b32.xlu1 %v2757_v14, %s3006_s28 }
  0xfd   : > { %1231 = vrot.lane.b32.xlu0 %v350_v12, %s3008_s30  ;;  %1024 = vrot.lane.b32.xlu1 %v2757_v14, %s3007_s29 }
 0x101   : > { %1444 = vrot.lane.b32.xlu0 %v350_v12, %s3009_s6  ;;  %1233 = vrot.lane.b32.xlu1 %v2754_v11, %s3008_s30 }
 0x105   : > { %1235 = vrot.lane.b32.xlu0 %v360_v15, %s3008_s30  ;;  %1446 = vrot.lane.b32.xlu1 %v2754_v11, %s3009_s6 }
 0x109   : > { %1448 = vrot.lane.b32.xlu0 %v360_v15, %s3009_s6  ;;  %1237 = vrot.lane.b32.xlu1 %v2757_v14, %s3008_s30 }
 0x10d   : > { %1657 = vrot.lane.b32.xlu0 %v350_v12, %s3010_s7  ;;  %1450 = vrot.lane.b32.xlu1 %v2757_v14, %s3009_s6 }
 0x111   : > { %1870 = vrot.lane.b32.xlu0 %v350_v12, %s3011_s8  ;;  %1659 = vrot.lane.b32.xlu1 %v2754_v11, %s3010_s7 }
 0x115   : > { %1661 = vrot.lane.b32.xlu0 %v360_v15, %s3010_s7  ;;  %1872 = vrot.lane.b32.xlu1 %v2754_v11, %s3011_s8 }
 0x119   : > { %1874 = vrot.lane.b32.xlu0 %v360_v15, %s3011_s8  ;;  %1663 = vrot.lane.b32.xlu1 %v2757_v14, %s3010_s7 }
 0x11d   : > { %1876 = vrot.lane.b32.xlu1 %v2757_v14, %s3011_s8 }
 0x157   : > { %v593_v16 = vpop.permute.xlu0 %592 }
 0x158   : > { %2786 = vmatprep.mubr.msk.f32.mxu1 %vm271_vm0, %v593_v16 }
 0x15b   : > { %v595_v17 = vpop.permute.xlu0 %594  ;;  %v597_v18 = vpop.permute.xlu1 %596 }
 0x15c   : > { %2787 = vmatmul.mubr.msk.f32.vlgmr.msra.gmra.mxu1 %vm271_vm0, %v595_v17 }
 0x15d   : > { %2789 = vmatprep.mubr.msk.f32.mxu1 %vm271_vm0, %v597_v18  ;;  %v2564_v18 = vld [vmem:[%s3093_s26 + $0x48] sm:$0xff] }
 0x15f   : > { %v599_v19 = vpop.permute.xlu1 %598  ;;  %v806_v43 = vpop.permute.xlu0 %805 }
 0x160   : > { %2790 = vmatmul.mubr.msk.f32.gmra.mxu1 %vm271_vm0, %v599_v19 }
 0x163   : > { %v808_v44 = vpop.permute.xlu1 %807  ;;  %v1019_v46 = vpop.permute.xlu0 %1018 }
 0x167   : > { %v1021_v47 = vpop.permute.xlu1 %1020  ;;  %v810_v48 = vpop.permute.xlu0 %809 }
 0x16b   : > { %v812_v49 = vpop.permute.xlu1 %811  ;;  %v1023_v0 = vpop.permute.xlu0 %1022 }
 0x16f   : > { %v1025_v1 = vpop.permute.xlu1 %1024  ;;  %v1232_v19 = vpop.permute.xlu0 %1231 }
 0x173   : > { %v1234_v20 = vpop.permute.xlu1 %1233  ;;  %v1445_v22 = vpop.permute.xlu0 %1444 }
 0x177   : > { %v1236_v24 = vpop.permute.xlu0 %1235 }
 0x1a6   : > { %v2764_v23 = vpop.f32.mrf.mxu1 }
 0x1a7   : > { %v480_v38 = vand.u32 2147483647, %v2764_v23  ;;  %v1447_v23 = vpop.permute.xlu1 %1446 }
 0x1a8   : > { %v460_v26 = vpop.f32.mrf.mxu1 }
 0x1a9   : > { %v479_v27 = vand.u32 2147483647, %v460_v26  ;;  %v3157_v41 = vsel %vm3149_vm5, 1.0, %v480_v38 }
 0x1ab   : > { %v3125_v29 = vsel %vm3119_vm1, 1.0, %v479_v27  ;;  %v2767_v31 = vpop.f32.mrf.mxu1  ;;  %v1238_v26 = vpop.permute.xlu1 %1237 }
 0x1ac   : > { %v482_v32 = vand.u32 2147483647, %v2767_v31  ;;  %2776 = vmatprep.mubr.msk.f32.mxu0 %vm487_vm2, %v3125_v29 }
 0x1ad   : > { %v470_v35 = vpop.f32.mrf.mxu1 }
 0x1ae   : > { %v3139_v36 = vsel %vm3127_vm3, 1.0, %v482_v32  ;;  %v481_v37 = vand.u32 2147483647, %v470_v35 }
 0x1af   : > { %2768 = vmatprep.subr.msk.mxu0 %vm487_vm2, %v3139_v36 }
 0x1b0   : > { %v3145_v39 = vsel %vm3133_vm4, 1.0, %v481_v37  ;;  %2769 = vmatpush3.xpose.msk.msra.mxu0 %vm487_vm2, %v3139_v36 }
 0x1b1   : > { %2770 = vmatprep.subr.msk.mxu0 %vm487_vm2, %v3145_v39 }
 0x1b4   : > { %2771 = vmatpush3.xpose.msk.msra.mxu0 %vm487_vm2, %v3145_v39 }
 0x1b5   : > { %2772 = vmatprep.subr.msk.mxu0 %vm487_vm2, %v3157_v41 }
 0x1b8   : > { %2773 = vmatpush3.xpose.msk.msra.mxu0 %vm487_vm2, %v3157_v41 }
 0x1b9   : > { %2774 = vmatprep.subr.msk.mxu0 %vm487_vm2, %v3125_v29 }
 0x1bc   : > { %2775 = vmatpush3.xpose.msk.msra.mxu0 %vm487_vm2, %v3125_v29 }
 0x1bd   : > { %2806 = vmatprep.subr.mxu0 %v2536_v42 }
 0x1bf   : > { %2777 = vmatmul.mubr.msk.f32.vlgmr.msra.gmra.mxu0 %vm487_vm2, %v3157_v41 }
 0x1c0   : > { %2779 = vmatprep.mubr.msk.f32.mxu0 %vm487_vm2, %v3145_v39  ;;  %2807 = vmatpush3.msra.mxu0 %v2536_v42 }
 0x1c1   : > { %2808 = vmatprep.subr.mxu0 %v2535_v45 }
 0x1c2   : > { %2809 = vmatpush3.msra.mxu0 %v2535_v45 }
 0x1c3   : > { %2780 = vmatmul.mubr.msk.f32.gmra.mxu0 %vm487_vm2, %v3139_v36 }
 0x1c4   : > { %2810 = vmatprep.mubr.msk.f32.mxu0 %vm271_vm0, %v806_v43 }
 0x1c7   : > { %2811 = vmatmul.mubr.msk.f32.vlgmr.msra.gmra.mxu0 %vm271_vm0, %v808_v44 }
 0x1c8   : > { %2813 = vmatprep.mubr.msk.f32.mxu0 %vm271_vm0, %v810_v48 }
 0x1cb   : > { %2814 = vmatmul.mubr.msk.f32.gmra.mxu0 %vm271_vm0, %v812_v49 }
 0x21c   : > { %v2788_v50 = vpop.f32.mrf.mxu1 }
 0x21d   : > { %v694_v51 = vand.u32 2147483647, %v2788_v50 }
 0x21e   : > { %v674_v52 = vpop.f32.mrf.mxu1 }
 0x21f   : > { %v698_v53 = vsel %vm3149_vm5, 1.0, %v694_v51  ;;  %v693_v54 = vand.u32 2147483647, %v674_v52 }
 0x220   : > { %2082 = vrot.lane.b32.xlu1 %v698_v53, %s3010_s7  ;;  %v2791_v55 = vpop.f32.mrf.mxu1 }
 0x221   : > { %v697_v56 = vsel %vm3119_vm1, 1.0, %v693_v54  ;;  %v696_v57 = vand.u32 2147483647, %v2791_v55  ;;  %v2578_v54 = vld [vmem:[%s3093_s26 + $0x58] sm:$0xff]  ;;  %v2577_v55 = vld [vmem:[%s3093_s26 + $0x50] sm:$0xff] }
 0x222   : > { %2080 = vrot.lane.b32.xlu0 %v697_v56, %s3010_s7  ;;  %v684_v58 = vpop.f32.mrf.mxu1  ;;  %2800 = vmatprep.mubr.msk.f32.mxu1 %vm487_vm2, %v697_v56 }
 0x223   : > { %v700_v59 = vsel %vm3127_vm3, 1.0, %v696_v57  ;;  %v695_v60 = vand.u32 2147483647, %v684_v58  ;;  %v1451_v57 = vpop.permute.xlu1 %1450 }
 0x224   : > { %2086 = vrot.lane.b32.xlu1 %v700_v59, %s3010_s7  ;;  %2792 = vmatprep.subr.msk.mxu1 %vm487_vm2, %v700_v59 }
 0x225   : > { %v699_v61 = vsel %vm3133_vm4, 1.0, %v695_v60  ;;  %2793 = vmatpush3.xpose.msk.msra.mxu1 %vm487_vm2, %v700_v59 }
 0x226   : > { %2084 = vrot.lane.b32.xlu0 %v699_v61, %s3010_s7  ;;  %2794 = vmatprep.subr.msk.mxu1 %vm487_vm2, %v699_v61 }
 0x227   : > { %v3291_v58 = vpop.permute.xlu1 %1659 }
 0x229   : > { %2795 = vmatpush3.xpose.msk.msra.mxu1 %vm487_vm2, %v699_v61 }
 0x22a   : > { %2796 = vmatprep.subr.msk.mxu1 %vm487_vm2, %v698_v53 }
 0x22b   : > { %v3295_v60 = vpop.permute.xlu1 %1872 }
 0x22d   : > { %2797 = vmatpush3.xpose.msk.msra.mxu1 %vm487_vm2, %v698_v53 }
 0x22e   : > { %2798 = vmatprep.subr.msk.mxu1 %vm487_vm2, %v697_v56 }
 0x231   : > { %2799 = vmatpush3.xpose.msk.msra.mxu1 %vm487_vm2, %v697_v56  ;;  %v1449_v56 = vpop.permute.xlu0 %1448 }
 0x232   : > { %2830 = vmatprep.subr.mxu1 %v2550_v62 }
 0x234   : > { %2801 = vmatmul.mubr.msk.f32.vlgmr.msra.gmra.mxu1 %vm487_vm2, %v698_v53 }
 0x235   : > { %2803 = vmatprep.mubr.msk.f32.mxu1 %vm487_vm2, %v699_v61  ;;  %2831 = vmatpush3.msra.mxu1 %v2550_v62  ;;  %v3299_v62 = vpop.permute.xlu1 %1663 }
 0x236   : > { %2832 = vmatprep.subr.mxu1 %v2549_v63 }
 0x237   : > { %2833 = vmatpush3.msra.mxu1 %v2549_v63 }
 0x238   : > { %2804 = vmatmul.mubr.msk.f32.gmra.mxu1 %vm487_vm2, %v700_v59  ;;  %v3293_v59 = vpop.permute.xlu0 %1657 }
 0x239   : > { %2834 = vmatprep.mubr.msk.f32.mxu1 %vm271_vm0, %v1019_v46 }
 0x23c   : > { %2835 = vmatmul.mubr.msk.f32.vlgmr.msra.gmra.mxu1 %vm271_vm0, %v1021_v47  ;;  %v3297_v61 = vpop.permute.xlu0 %1870 }
 0x23d   : > { %2837 = vmatprep.mubr.msk.f32.mxu1 %vm271_vm0, %v1023_v0  ;;  %v3303_v0 = vpop.permute.xlu1 %1876 }
 0x240   : > { %2838 = vmatmul.mubr.msk.f32.gmra.mxu1 %vm271_vm0, %v1025_v1  ;;  %v3301_v63 = vpop.permute.xlu0 %1661 }
 0x244   : > { %v3305_v1 = vpop.permute.xlu0 %1874 }
 0x27f   : > { %v3211_v2 = vpop.f32.mrf.mxu0 }
 0x281   : > { %v3213_v3 = vpop.f32.mrf.mxu0 }
 0x283   : > { %v3215_v4 = vpop.f32.mrf.mxu0 }
 0x285   : > { %v3217_v5 = vpop.f32.mrf.mxu0 }
 0x287   : > { %v2812_v6 = vpop.f32.mrf.mxu0 }
 0x288   : > { %v907_v7 = vand.u32 2147483647, %v2812_v6 }
 0x289   : > { %v887_v8 = vpop.f32.mrf.mxu0 }
 0x28a   : > { %v911_v9 = vsel %vm3149_vm5, 1.0, %v907_v7  ;;  %v906_v10 = vand.u32 2147483647, %v887_v8 }
 0x28b   : > { %2094 = vrot.lane.b32.xlu1 %v911_v9, %s3008_s30  ;;  %v2815_v11 = vpop.f32.mrf.mxu0 }
 0x28c   : > { %v910_v12 = vsel %vm3119_vm1, 1.0, %v906_v10  ;;  %v909_v13 = vand.u32 2147483647, %v2815_v11 }
 0x28d   : > { %2092 = vrot.lane.b32.xlu0 %v910_v12, %s3008_s30  ;;  %v897_v14 = vpop.f32.mrf.mxu0  ;;  %2824 = vmatprep.mubr.msk.f32.mxu0 %vm487_vm2, %v910_v12 }
 0x28e   : > { %v913_v15 = vsel %vm3127_vm3, 1.0, %v909_v13  ;;  %v908_v16 = vand.u32 2147483647, %v897_v14 }
 0x28f   : > { %2098 = vrot.lane.b32.xlu1 %v913_v15, %s3008_s30  ;;  %2816 = vmatprep.subr.msk.mxu0 %vm487_vm2, %v913_v15 }
 0x290   : > { %v912_v17 = vsel %vm3133_vm4, 1.0, %v908_v16  ;;  %2817 = vmatpush3.xpose.msk.msra.mxu0 %vm487_vm2, %v913_v15 }
 0x291   : > { %2096 = vrot.lane.b32.xlu0 %v912_v17, %s3008_s30  ;;  %2818 = vmatprep.subr.msk.mxu0 %vm487_vm2, %v912_v17 }
 0x292   : > { %v2083_v6 = vpop.permute.xlu1 %2082 }
 0x294   : > { %2819 = vmatpush3.xpose.msk.msra.mxu0 %vm487_vm2, %v912_v17  ;;  %v2081_v7 = vpop.permute.xlu0 %2080 }
 0x295   : > { %2820 = vmatprep.subr.msk.mxu0 %vm487_vm2, %v911_v9 }
 0x296   : > { %v2087_v8 = vpop.permute.xlu1 %2086 }
 0x298   : > { %2821 = vmatpush3.xpose.msk.msra.mxu0 %vm487_vm2, %v911_v9 }
 0x299   : > { %2822 = vmatprep.subr.msk.mxu0 %vm487_vm2, %v910_v12 }
 0x29c   : > { %2823 = vmatpush3.xpose.msk.msra.mxu0 %vm487_vm2, %v910_v12 }
 0x29d   : > { %2854 = vmatprep.subr.mxu0 %v2564_v18 }
 0x29f   : > { %2825 = vmatmul.mubr.msk.f32.vlgmr.msra.gmra.mxu0 %vm487_vm2, %v911_v9  ;;  %v3307_v9 = vpop.permute.xlu0 %2084 }
 0x2a0   : > { %2827 = vmatprep.mubr.msk.f32.mxu0 %vm487_vm2, %v912_v17  ;;  %2855 = vmatpush3.msra.mxu0 %v2564_v18 }
 0x2a1   : > { %2856 = vmatprep.subr.mxu0 %v2563_v21 }
 0x2a2   : > { %2857 = vmatpush3.msra.mxu0 %v2563_v21 }
 0x2a3   : > { %2828 = vmatmul.mubr.msk.f32.gmra.mxu0 %vm487_vm2, %v913_v15 }
 0x2a4   : > { %2858 = vmatprep.mubr.msk.f32.mxu0 %vm271_vm0, %v1232_v19 }
 0x2a7   : > { %2859 = vmatmul.mubr.msk.f32.vlgmr.msra.gmra.mxu0 %vm271_vm0, %v1234_v20 }
 0x2a8   : > { %2861 = vmatprep.mubr.msk.f32.mxu0 %vm271_vm0, %v1236_v24 }
 0x2ab   : > { %2862 = vmatmul.mubr.msk.f32.gmra.mxu0 %vm271_vm0, %v1238_v26 }
 0x2f4   : > { %v2802_v27 = vpop.f32.mrf.mxu1 }
 0x2f5   : > { %v799_v28 = vsel %vm3149_vm5, 1.0, %v2802_v27 }
 0x2f6   : > { %v779_v31 = vpop.f32.mrf.mxu1  ;;  %2192 = vrot.lane.b32.xlu1 %v799_v28, %s3010_s7  ;;  %v585_v28 = vsel %vm3119_vm1, 1.0, %v3213_v3 }
 0x2f7   : > { %v798_v32 = vsel %vm3119_vm1, 1.0, %v779_v31 }
 0x2f8   : > { %v2805_v33 = vpop.f32.mrf.mxu1  ;;  %2190 = vrot.lane.b32.xlu0 %v798_v32, %s3010_s7 }
 0x2f9   : > { %v801_v35 = vsel %vm3127_vm3, 1.0, %v2805_v33 }
 0x2fa   : > { %v789_v37 = vpop.f32.mrf.mxu1  ;;  %2196 = vrot.lane.b32.xlu1 %v801_v35, %s3010_s7 }
 0x2fb   : > { %v800_v38 = vsel %vm3133_vm4, 1.0, %v789_v37 }
 0x2fc   : > { %v2836_v42 = vpop.f32.mrf.mxu1  ;;  %2194 = vrot.lane.b32.xlu0 %v800_v38, %s3010_s7 }
 0x2fd   : > { %v1120_v43 = vand.u32 2147483647, %v2836_v42  ;;  %v2095_v10 = vpop.permute.xlu1 %2094 }
 0x2fe   : > { %v1100_v44 = vpop.f32.mrf.mxu1 }
 0x2ff   : > { %v1124_v45 = vsel %vm3149_vm5, 1.0, %v1120_v43  ;;  %v1119_v46 = vand.u32 2147483647, %v1100_v44  ;;  %v2093_v12 = vpop.permute.xlu0 %2092 }
 0x300   : > { %v2839_v47 = vpop.f32.mrf.mxu1  ;;  %2106 = vrot.lane.b32.xlu1 %v1124_v45, %s3006_s28 }
 0x301   : > { %v1123_v48 = vsel %vm3119_vm1, 1.0, %v1119_v46  ;;  %v1122_v49 = vand.u32 2147483647, %v2839_v47  ;;  %v2099_v17 = vpop.permute.xlu1 %2098 }
 0x302   : > { %v1110_v50 = vpop.f32.mrf.mxu1  ;;  %2848 = vmatprep.mubr.msk.f32.mxu1 %vm487_vm2, %v1123_v48  ;;  %2104 = vrot.lane.b32.xlu0 %v1123_v48, %s3006_s28 }
 0x303   : > { %v1126_v51 = vsel %vm3127_vm3, 1.0, %v1122_v49  ;;  %v1121_v52 = vand.u32 2147483647, %v1110_v50  ;;  %v2097_v20 = vpop.permute.xlu0 %2096 }
 0x304   : > { %2840 = vmatprep.subr.msk.mxu1 %vm487_vm2, %v1126_v51  ;;  %2110 = vrot.lane.b32.xlu1 %v1126_v51, %s3006_s28 }
 0x305   : > { %v1125_v53 = vsel %vm3133_vm4, 1.0, %v1121_v52  ;;  %2841 = vmatpush3.xpose.msk.msra.mxu1 %vm487_vm2, %v1126_v51  ;;  %v2152_v52 = vsel %vm487_vm2, %v3125_v29, %v2081_v7  ;;  %v2155_v29 = vsel %vm487_vm2, %v3139_v36, %v2087_v8  ;;  %v2154_v7 = vsel %vm487_vm2, %v3145_v39, %v3307_v9  ;;  %v2591_v39 = vld [vmem:[%s3093_s26 + $0x60] sm:$0xff] }
 0x306   : > { %2842 = vmatprep.subr.msk.mxu1 %vm487_vm2, %v1125_v53  ;;  %2108 = vrot.lane.b32.xlu0 %v1125_v53, %s3006_s28 }
 0x309   : > { %2843 = vmatpush3.xpose.msk.msra.mxu1 %vm487_vm2, %v1125_v53 }
 0x30a   : > { %2844 = vmatprep.subr.msk.mxu1 %vm487_vm2, %v1124_v45 }
 0x30d   : > { %2845 = vmatpush3.xpose.msk.msra.mxu1 %vm487_vm2, %v1124_v45 }
 0x30e   : > { %2846 = vmatprep.subr.msk.mxu1 %vm487_vm2, %v1123_v48 }
 0x311   : > { %2847 = vmatpush3.xpose.msk.msra.mxu1 %vm487_vm2, %v1123_v48 }
 0x312   : > { %2878 = vmatprep.subr.mxu1 %v2578_v54 }
 0x314   : > { %2849 = vmatmul.mubr.msk.f32.vlgmr.msra.gmra.mxu1 %vm487_vm2, %v1124_v45 }
 0x315   : > { %2851 = vmatprep.mubr.msk.f32.mxu1 %vm487_vm2, %v1125_v53  ;;  %2879 = vmatpush3.msra.mxu1 %v2578_v54  ;;  %v2157_v54 = vsel %vm2156_vm6, %v2152_v52, %v2093_v12  ;;  %v2592_v12 = vld [vmem:[%s3093_s26 + $0x68] sm:$0xff] }
 0x316   : > { %2880 = vmatprep.subr.mxu1 %v2577_v55 }
 0x317   : > { %2881 = vmatpush3.msra.mxu1 %v2577_v55 }
 0x318   : > { %2852 = vmatmul.mubr.msk.f32.gmra.mxu1 %vm487_vm2, %v1126_v51 }
 0x319   : > { %2882 = vmatprep.mubr.msk.f32.mxu1 %vm271_vm0, %v1445_v22 }
 0x31c   : > { %2883 = vmatmul.mubr.msk.f32.vlgmr.msra.gmra.mxu1 %vm271_vm0, %v1447_v23  ;;  %v586_v23 = vsel %vm3149_vm5, 1.0, %v3211_v2  ;;  %v588_v2 = vsel %vm3127_vm3, 1.0, %v3215_v4  ;;  %v587_v4 = vsel %vm3133_vm4, 1.0, %v3217_v5  ;;  %v2153_v5 = vsel %vm487_vm2, %v3157_v41, %v2083_v6 }
 0x31d   : > { %2885 = vmatprep.mubr.msk.f32.mxu1 %vm271_vm0, %v1449_v56  ;;  %v2158_v50 = vsel %vm2156_vm6, %v2153_v5, %v2095_v10 }
 0x320   : > { %2886 = vmatmul.mubr.msk.f32.gmra.mxu1 %vm271_vm0, %v1451_v57  ;;  %v2160_v57 = vsel %vm2156_vm6, %v2155_v29, %v2099_v17 }
 0x35f   : > { %v2826_v11 = vpop.f32.mrf.mxu0 }
 0x360   : > { %v1012_v13 = vsel %vm3149_vm5, 1.0, %v2826_v11  ;;  %v2159_v11 = vsel %vm2156_vm6, %v2154_v7, %v2097_v20 }
 0x361   : > { %2208 = vrot.lane.b32.xlu1 %v1012_v13, %s3008_s30  ;;  %v992_v14 = vpop.f32.mrf.mxu0 }
 0x362   : > { %v1011_v15 = vsel %vm3119_vm1, 1.0, %v992_v14 }
 0x363   : > { %2206 = vrot.lane.b32.xlu0 %v1011_v15, %s3008_s30  ;;  %v2829_v16 = vpop.f32.mrf.mxu0 }
 0x364   : > { %v1014_v18 = vsel %vm3127_vm3, 1.0, %v2829_v16 }
 0x365   : > { %2212 = vrot.lane.b32.xlu1 %v1014_v18, %s3008_s30  ;;  %v1002_v19 = vpop.f32.mrf.mxu0 }
 0x366   : > { %v1013_v21 = vsel %vm3133_vm4, 1.0, %v1002_v19 }
 0x367   : > { %v2860_v22 = vpop.f32.mrf.mxu0  ;;  %2210 = vrot.lane.b32.xlu0 %v1013_v21, %s3008_s30 }
 0x368   : > { %v2193_v24 = vpop.permute.xlu1 %2192  ;;  %v1333_v48 = vand.u32 2147483647, %v2860_v22 }
 0x369   : > { %v3325_v26 = vsel %vm487_vm2, %v586_v23, %v2193_v24  ;;  %v1313_v27 = vpop.f32.mrf.mxu0 }
 0x36a   : > { %v1332_v31 = vand.u32 2147483647, %v1313_v27  ;;  %v2191_v32 = vpop.permute.xlu0 %2190  ;;  %v3378_v55 = vsel %vm3149_vm5, 1.0, %v1333_v48 }
 0x36b   : > { %v3331_v33 = vsel %vm487_vm2, %v585_v28, %v2191_v32  ;;  %v2863_v35 = vpop.f32.mrf.mxu0  ;;  %v2606_v32 = vld [vmem:[%s3093_s26 + $0x78] sm:$0xff] }
 0x36c   : > { %v3338_v37 = vsel %vm3119_vm1, 1.0, %v1332_v31  ;;  %v1335_v38 = vand.u32 2147483647, %v2863_v35  ;;  %v2197_v42 = vpop.permute.xlu1 %2196  ;;  %v2605_v35 = vld [vmem:[%s3093_s26 + $0x70] sm:$0xff] }
 0x36d   : > { %v3341_v43 = vsel %vm487_vm2, %v588_v2, %v2197_v42  ;;  %v1323_v3 = vpop.f32.mrf.mxu0  ;;  %2872 = vmatprep.mubr.msk.f32.mxu0 %vm487_vm2, %v3338_v37 }
 0x36e   : > { %v3354_v44 = vsel %vm3127_vm3, 1.0, %v1335_v38  ;;  %v1334_v45 = vand.u32 2147483647, %v1323_v3  ;;  %v2195_v46 = vpop.permute.xlu0 %2194 }
 0x36f   : > { %v3357_v47 = vsel %vm487_vm2, %v587_v4, %v2195_v46  ;;  %2864 = vmatprep.subr.msk.mxu0 %vm487_vm2, %v3354_v44 }
 0x370   : > { %v3363_v49 = vsel %vm3133_vm4, 1.0, %v1334_v45  ;;  %2865 = vmatpush3.xpose.msk.msra.mxu0 %vm487_vm2, %v3354_v44 }
 0x371   : > { %2866 = vmatprep.subr.msk.mxu0 %vm487_vm2, %v3363_v49 }
 0x372   : > { %v2107_v51 = vpop.permute.xlu1 %2106 }
 0x373   : > { %v2163_v53 = vsel %vm2161_vm7, %v2158_v50, %v2107_v51 }
 0x374   : > { %2180 = vst [vmem:[%s3381_s15 + $0x10] sm:$0xff] %v2163_v53  ;;  %2867 = vmatpush3.xpose.msk.msra.mxu0 %vm487_vm2, %v3363_v49  ;;  %v2105_v41 = vpop.permute.xlu0 %2104 }
 0x375   : > { %v2162_v56 = vsel %vm2161_vm7, %v2157_v54, %v2105_v41  ;;  %2868 = vmatprep.subr.msk.mxu0 %vm487_vm2, %v3378_v55 }
 0x376   : > { %2178 = vst [vmem:[%s3381_s15] sm:$0xff] %v2162_v56  ;;  %v2111_v6 = vpop.permute.xlu1 %2110 }
 0x377   : > { %v2165_v10 = vsel %vm2161_vm7, %v2160_v57, %v2111_v6 }
 0x378   : > { %2184 = vst [vmem:[%s3381_s15 + $0x30] sm:$0xff] %v2165_v10  ;;  %2869 = vmatpush3.xpose.msk.msra.mxu0 %vm487_vm2, %v3378_v55  ;;  %v2109_v36 = vpop.permute.xlu0 %2108 }
 0x379   : > { %v2164_v8 = vsel %vm2161_vm7, %v2159_v11, %v2109_v36  ;;  %2870 = vmatprep.subr.msk.mxu0 %vm487_vm2, %v3338_v37 }
 0x37a   : > { %2182 = vst [vmem:[%s3381_s15 + $0x20] sm:$0xff] %v2164_v8 }
 0x37c   : > { %2871 = vmatpush3.xpose.msk.msra.mxu0 %vm487_vm2, %v3338_v37 }
 0x37d   : > { %2902 = vmatprep.subr.mxu0 %v2592_v12 }
 0x37f   : > { %2873 = vmatmul.mubr.msk.f32.vlgmr.msra.gmra.mxu0 %vm487_vm2, %v3378_v55 }
 0x380   : > { %2875 = vmatprep.mubr.msk.f32.mxu0 %vm487_vm2, %v3363_v49  ;;  %2903 = vmatpush3.msra.mxu0 %v2592_v12 }
 0x381   : > { %2904 = vmatprep.subr.mxu0 %v2591_v39 }
 0x382   : > { %2905 = vmatpush3.msra.mxu0 %v2591_v39 }
 0x383   : > { %2876 = vmatmul.mubr.msk.f32.gmra.mxu0 %vm487_vm2, %v3354_v44 }
 0x384   : > { %2906 = vmatprep.mubr.msk.f32.mxu0 %vm271_vm0, %v3293_v59 }
 0x387   : > { %2907 = vmatmul.mubr.msk.f32.vlgmr.msra.gmra.mxu0 %vm271_vm0, %v3291_v58 }
 0x388   : > { %2909 = vmatprep.mubr.msk.f32.mxu0 %vm271_vm0, %v3301_v63 }
 0x38b   : > { %2910 = vmatmul.mubr.msk.f32.gmra.mxu0 %vm271_vm0, %v3299_v62 }
 0x3d3   : > { %v2209_v2 = vpop.permute.xlu1 %2208 }
 0x3d4   : > { %v2850_v9 = vpop.f32.mrf.mxu1 }
 0x3d5   : > { %v1225_v13 = vsel %vm3149_vm5, 1.0, %v2850_v9  ;;  %v2207_v42 = vpop.permute.xlu0 %2206 }
 0x3d6   : > { %v1205_v14 = vpop.f32.mrf.mxu1  ;;  %2224 = vrot.lane.b32.xlu1 %v1225_v13, %s3006_s28  ;;  %v2286_v51 = vsel %vm2156_vm6, %v3331_v33, %v2207_v42 }
 0x3d7   : > { %v1224_v15 = vsel %vm3119_vm1, 1.0, %v1205_v14  ;;  %v2213_v45 = vpop.permute.xlu1 %2212 }
 0x3d8   : > { %v2853_v59 = vpop.f32.mrf.mxu1  ;;  %2222 = vrot.lane.b32.xlu0 %v1224_v15, %s3006_s28  ;;  %v2289_v29 = vsel %vm2156_vm6, %v3341_v43, %v2213_v45 }
 0x3d9   : > { %v1227_v58 = vsel %vm3127_vm3, 1.0, %v2853_v59  ;;  %v2211_v46 = vpop.permute.xlu0 %2210 }
 0x3da   : > { %v1215_v63 = vpop.f32.mrf.mxu1  ;;  %2228 = vrot.lane.b32.xlu1 %v1227_v58, %s3006_s28  ;;  %v2288_v10 = vsel %vm2156_vm6, %v3357_v47, %v2211_v46 }
 0x3db   : > { %v1226_v62 = vsel %vm3133_vm4, 1.0, %v1215_v63 }
 0x3dc   : > { %v2884_v16 = vpop.f32.mrf.mxu1  ;;  %2226 = vrot.lane.b32.xlu0 %v1226_v62, %s3006_s28 }
 0x3dd   : > { %v1546_v17 = vand.u32 2147483647, %v2884_v16 }
 0x3de   : > { %v1526_v18 = vpop.f32.mrf.mxu1 }
 0x3df   : > { %v1550_v19 = vsel %vm3149_vm5, 1.0, %v1546_v17  ;;  %v1545_v20 = vand.u32 2147483647, %v1526_v18 }
 0x3e0   : > { %v2887_v21 = vpop.f32.mrf.mxu1  ;;  %2118 = vrot.lane.b32.xlu1 %v1550_v19, %s3010_s7 }
 0x3e1   : > { %v1549_v22 = vsel %vm3119_vm1, 1.0, %v1545_v20  ;;  %v1548_v23 = vand.u32 2147483647, %v2887_v21 }
 0x3e2   : > { %v1536_v24 = vpop.f32.mrf.mxu1  ;;  %2896 = vmatprep.mubr.msk.f32.mxu1 %vm487_vm2, %v1549_v22  ;;  %2116 = vrot.lane.b32.xlu0 %v1549_v22, %s3010_s7 }
 0x3e3   : > { %v1552_v27 = vsel %vm3127_vm3, 1.0, %v1548_v23  ;;  %v1547_v28 = vand.u32 2147483647, %v1536_v24 }
 0x3e4   : > { %2888 = vmatprep.subr.msk.mxu1 %vm487_vm2, %v1552_v27  ;;  %2122 = vrot.lane.b32.xlu1 %v1552_v27, %s3010_s7 }
 0x3e5   : > { %v1551_v31 = vsel %vm3133_vm4, 1.0, %v1547_v28  ;;  %2889 = vmatpush3.xpose.msk.msra.mxu1 %vm487_vm2, %v1552_v27 }
 0x3e6   : > { %2890 = vmatprep.subr.msk.mxu1 %vm487_vm2, %v1551_v31  ;;  %2120 = vrot.lane.b32.xlu0 %v1551_v31, %s3010_s7 }
 0x3e9   : > { %2891 = vmatpush3.xpose.msk.msra.mxu1 %vm487_vm2, %v1551_v31 }
 0x3ea   : > { %2892 = vmatprep.subr.msk.mxu1 %vm487_vm2, %v1550_v19 }
 0x3ed   : > { %2893 = vmatpush3.xpose.msk.msra.mxu1 %vm487_vm2, %v1550_v19 }
 0x3ee   : > { %2894 = vmatprep.subr.msk.mxu1 %vm487_vm2, %v1549_v22 }
 0x3f1   : > { %2895 = vmatpush3.xpose.msk.msra.mxu1 %vm487_vm2, %v1549_v22 }
 0x3f2   : > { %2926 = vmatprep.subr.mxu1 %v2606_v32 }
 0x3f4   : > { %2897 = vmatmul.mubr.msk.f32.vlgmr.msra.gmra.mxu1 %vm487_vm2, %v1550_v19 }
 0x3f5   : > { %2899 = vmatprep.mubr.msk.f32.mxu1 %vm487_vm2, %v1551_v31  ;;  %2927 = vmatpush3.msra.mxu1 %v2606_v32 }
 0x3f6   : > { %2928 = vmatprep.subr.mxu1 %v2605_v35 }
 0x3f7   : > { %2929 = vmatpush3.msra.mxu1 %v2605_v35 }
 0x3f8   : > { %2900 = vmatmul.mubr.msk.f32.gmra.mxu1 %vm487_vm2, %v1552_v27 }
 0x3f9   : > { %2930 = vmatprep.mubr.msk.f32.mxu1 %vm271_vm0, %v3297_v61 }
 0x3fc   : > { %2931 = vmatmul.mubr.msk.f32.vlgmr.msra.gmra.mxu1 %vm271_vm0, %v3295_v60 }
 0x3fd   : > { %2933 = vmatprep.mubr.msk.f32.mxu1 %vm271_vm0, %v3305_v1  ;;  %v2287_v1 = vsel %vm2156_vm6, %v3325_v26, %v2209_v2 }
 0x400   : > { %2934 = vmatmul.mubr.msk.f32.gmra.mxu1 %vm271_vm0, %v3303_v0 }
 0x43f   : > { %v3469_v38 = vpop.f32.mrf.mxu0 }
 0x441   : > { %v3471_v3 = vpop.f32.mrf.mxu0 }
 0x443   : > { %v3473_v4 = vpop.f32.mrf.mxu0 }
 0x445   : > { %v3475_v61 = vpop.f32.mrf.mxu0 }
 0x447   : > { %v2908_v60 = vpop.f32.mrf.mxu0 }
 0x448   : > { %v1759_v48 = vand.u32 2147483647, %v2908_v60  ;;  %v2225_v5 = vpop.permute.xlu1 %2224 }
 0x449   : > { %v2291_v0 = vsel %vm2161_vm7, %v2287_v1, %v2225_v5  ;;  %v1739_v50 = vpop.f32.mrf.mxu0 }
 0x44a   : > { %v1763_v52 = vsel %vm3149_vm5, 1.0, %v1759_v48  ;;  %2308 = vst [vmem:[%s3485_s5 + $0x10] sm:$0xff] %v2291_v0  ;;  %v1758_v53 = vand.u32 2147483647, %v1739_v50  ;;  %v2223_v54 = vpop.permute.xlu0 %2222 }
 0x44b   : > { %2130 = vrot.lane.b32.xlu1 %v1763_v52, %s3008_s30  ;;  %v2911_v26 = vpop.f32.mrf.mxu0  ;;  %v2290_v41 = vsel %vm2161_vm7, %v2286_v51, %v2223_v54 }
 0x44c   : > { %v1762_v33 = vsel %vm3119_vm1, 1.0, %v1758_v53  ;;  %v1761_v56 = vand.u32 2147483647, %v2911_v26  ;;  %2306 = vst [vmem:[%s3485_s5] sm:$0xff] %v2290_v41  ;;  %v2229_v57 = vpop.permute.xlu1 %2228  ;;  %v1438_v53 = vsel %vm3149_vm5, 1.0, %v3469_v38  ;;  %v1437_v41 = vsel %vm3119_vm1, 1.0, %v3471_v3 }
 0x44d   : > { %v2293_v6 = vsel %vm2161_vm7, %v2289_v29, %v2229_v57  ;;  %v1749_v7 = vpop.f32.mrf.mxu0  ;;  %2920 = vmatprep.mubr.msk.f32.mxu0 %vm487_vm2, %v1762_v33  ;;  %2128 = vrot.lane.b32.xlu0 %v1762_v33, %s3008_s30  ;;  %v1439_v38 = vsel %vm3133_vm4, 1.0, %v3475_v61 }
 0x44e   : > { %v1765_v43 = vsel %vm3127_vm3, 1.0, %v1761_v56  ;;  %2312 = vst [vmem:[%s3485_s5 + $0x30] sm:$0xff] %v2293_v6  ;;  %v1760_v11 = vand.u32 2147483647, %v1749_v7  ;;  %v2227_v36 = vpop.permute.xlu0 %2226  ;;  %v1440_v56 = vsel %vm3127_vm3, 1.0, %v3473_v4 }
 0x44f   : > { %2134 = vrot.lane.b32.xlu1 %v1765_v43, %s3008_s30  ;;  %2912 = vmatprep.subr.msk.mxu0 %vm487_vm2, %v1765_v43  ;;  %v2292_v8 = vsel %vm2161_vm7, %v2288_v10, %v2227_v36 }
 0x450   : > { %v1764_v12 = vsel %vm3133_vm4, 1.0, %v1760_v11  ;;  %2310 = vst [vmem:[%s3485_s5 + $0x20] sm:$0xff] %v2292_v8  ;;  %2913 = vmatpush3.xpose.msk.msra.mxu0 %vm487_vm2, %v1765_v43 }
 0x451   : > { %2914 = vmatprep.subr.msk.mxu0 %vm487_vm2, %v1764_v12  ;;  %2132 = vrot.lane.b32.xlu0 %v1764_v12, %s3008_s30 }
 0x452   : > { %v2119_v28 = vpop.permute.xlu1 %2118 }
 0x453   : > { %v2167_v3 = vsel %vm487_vm2, %v3378_v55, %v2119_v28 }
 0x454   : > { %2915 = vmatpush3.xpose.msk.msra.mxu0 %vm487_vm2, %v1764_v12  ;;  %v2117_v31 = vpop.permute.xlu0 %2116 }
 0x455   : > { %2916 = vmatprep.subr.msk.mxu0 %vm487_vm2, %v1763_v52  ;;  %v2166_v4 = vsel %vm487_vm2, %v3338_v37, %v2117_v31 }
 0x456   : > { %v2123_v32 = vpop.permute.xlu1 %2122 }
 0x458   : > { %2917 = vmatpush3.xpose.msk.msra.mxu0 %vm487_vm2, %v1763_v52  ;;  %v2121_v35 = vpop.permute.xlu0 %2120 }
 0x459   : > { %2918 = vmatprep.subr.msk.mxu0 %vm487_vm2, %v1762_v33 }
 0x45c   : > { %2919 = vmatpush3.xpose.msk.msra.mxu0 %vm487_vm2, %v1762_v33 }
 0x45f   : > { %2921 = vmatmul.mubr.msk.f32.vlgmr.msra.gmra.mxu0 %vm487_vm2, %v1763_v52 }
 0x460   : > { %2923 = vmatprep.mubr.msk.f32.mxu0 %vm487_vm2, %v1764_v12  ;;  %v2169_v12 = vsel %vm487_vm2, %v3354_v44, %v2123_v32 }
 0x463   : > { %2924 = vmatmul.mubr.msk.f32.gmra.mxu0 %vm487_vm2, %v1765_v43 }
 0x4b4   : > { %v2898_v47 = vpop.f32.mrf.mxu1 }
 0x4b5   : > { %v1651_v39 = vsel %vm3149_vm5, 1.0, %v2898_v47 }
 0x4b6   : > { %v1631_v9 = vpop.f32.mrf.mxu1  ;;  %2240 = vrot.lane.b32.xlu1 %v1651_v39, %s3010_s7 }
 0x4b7   : > { %v1650_v13 = vsel %vm3119_vm1, 1.0, %v1631_v9  ;;  %v2168_v9 = vsel %vm487_vm2, %v3363_v49, %v2121_v35 }
 0x4b8   : > { %v2901_v14 = vpop.f32.mrf.mxu1  ;;  %2238 = vrot.lane.b32.xlu0 %v1650_v13, %s3010_s7 }
 0x4b9   : > { %v1653_v15 = vsel %vm3127_vm3, 1.0, %v2901_v14 }
 0x4ba   : > { %v1641_v59 = vpop.f32.mrf.mxu1  ;;  %2244 = vrot.lane.b32.xlu1 %v1653_v15, %s3010_s7 }
 0x4bb   : > { %v1652_v58 = vsel %vm3133_vm4, 1.0, %v1641_v59 }
 0x4bc   : > { %v2932_v63 = vpop.f32.mrf.mxu1  ;;  %2242 = vrot.lane.b32.xlu0 %v1652_v58, %s3010_s7 }
 0x4bd   : > { %v1972_v62 = vand.u32 2147483647, %v2932_v63  ;;  %v2131_v2 = vpop.permute.xlu1 %2130 }
 0x4be   : > { %v1952_v16 = vpop.f32.mrf.mxu1  ;;  %v2171_v43 = vsel %vm2156_vm6, %v2167_v3, %v2131_v2  ;;  %v2340_v2 = vld [vmem:[%s3381_s15] sm:$0xff] (%p3062_p5) }
 0x4bf   : > { %v1976_v17 = vsel %vm3149_vm5, 1.0, %v1972_v62  ;;  %v1971_v18 = vand.u32 2147483647, %v1952_v16  ;;  %v2129_v45 = vpop.permute.xlu0 %2128  ;;  %2341 = vst [vmem:[%s2327_s13] sm:$0xff] (%p3062_p5), %v2340_v2 }
 0x4c0   : > { %v2935_v19 = vpop.f32.mrf.mxu1  ;;  %2142 = vrot.lane.b32.xlu1 %v1976_v17, %s3006_s28  ;;  %v2170_v8 = vsel %vm2156_vm6, %v2166_v4, %v2129_v45  ;;  %v2344_v45 = vld [vmem:[%s3381_s15 + $0x10] sm:$0xff] (%p3062_p5) }
 0x4c1   : > { %v1975_v20 = vsel %vm3119_vm1, 1.0, %v1971_v18  ;;  %v1974_v21 = vand.u32 2147483647, %v2935_v19  ;;  %v2135_v5 = vpop.permute.xlu1 %2134  ;;  %2345 = vst [vmem:[%s2327_s13 + $0x20] sm:$0xff] (%p3062_p5), %v2344_v45 }
 0x4c2   : > { %v1962_v22 = vpop.f32.mrf.mxu1  ;;  %2944 = vmatprep.mubr.msk.f32.mxu1 %vm487_vm2, %v1975_v20  ;;  %2140 = vrot.lane.b32.xlu0 %v1975_v20, %s3006_s28  ;;  %v2173_v55 = vsel %vm2156_vm6, %v2169_v12, %v2135_v5 }
 0x4c3   : > { %v1978_v23 = vsel %vm3127_vm3, 1.0, %v1974_v21  ;;  %v1973_v24 = vand.u32 2147483647, %v1962_v22  ;;  %v2133_v51 = vpop.permute.xlu0 %2132 }
 0x4c4   : > { %2936 = vmatprep.subr.msk.mxu1 %vm487_vm2, %v1978_v23  ;;  %2146 = vrot.lane.b32.xlu1 %v1978_v23, %s3006_s28  ;;  %v2172_v13 = vsel %vm2156_vm6, %v2168_v9, %v2133_v51 }
 0x4c5   : > { %v1977_v27 = vsel %vm3133_vm4, 1.0, %v1973_v24  ;;  %2937 = vmatpush3.xpose.msk.msra.mxu1 %vm487_vm2, %v1978_v23 }
 0x4c6   : > { %2938 = vmatprep.subr.msk.mxu1 %vm487_vm2, %v1977_v27  ;;  %2144 = vrot.lane.b32.xlu0 %v1977_v27, %s3006_s28 }
 0x4c9   : > { %2939 = vmatpush3.xpose.msk.msra.mxu1 %vm487_vm2, %v1977_v27 }
 0x4ca   : > { %2940 = vmatprep.subr.msk.mxu1 %vm487_vm2, %v1976_v17 }
 0x4cd   : > { %2941 = vmatpush3.xpose.msk.msra.mxu1 %vm487_vm2, %v1976_v17 }
 0x4ce   : > { %2942 = vmatprep.subr.msk.mxu1 %vm487_vm2, %v1975_v20 }
 0x4d1   : > { %2943 = vmatpush3.xpose.msk.msra.mxu1 %vm487_vm2, %v1975_v20 }
 0x4d4   : > { %2945 = vmatmul.mubr.msk.f32.vlgmr.msra.gmra.mxu1 %vm487_vm2, %v1976_v17 }
 0x4d5   : > { %2947 = vmatprep.mubr.msk.f32.mxu1 %vm487_vm2, %v1977_v27 }
 0x4d8   : > { %2948 = vmatmul.mubr.msk.f32.gmra.mxu1 %vm487_vm2, %v1978_v23 }
 0x51f   : > { %v2922_v42 = vpop.f32.mrf.mxu0 }
 0x520   : > { %v1864_v46 = vsel %vm3149_vm5, 1.0, %v2922_v42 }
 0x521   : > { %2256 = vrot.lane.b32.xlu1 %v1864_v46, %s3008_s30  ;;  %v1844_v60 = vpop.f32.mrf.mxu0 }
 0x522   : > { %v1863_v1 = vsel %vm3119_vm1, 1.0, %v1844_v60  ;;  %v2348_v60 = vld [vmem:[%s3381_s15 + $0x20] sm:$0xff] (%p3062_p5) }
 0x523   : > { %v2925_v48 = vpop.f32.mrf.mxu0  ;;  %2254 = vrot.lane.b32.xlu0 %v1863_v1, %s3008_s30  ;;  %2349 = vst [vmem:[%s2327_s13 + $0x40] sm:$0xff] (%p3062_p5), %v2348_v60 }
 0x524   : > { %v1866_v0 = vsel %vm3127_vm3, 1.0, %v2925_v48  ;;  %v2352_v48 = vld [vmem:[%s3381_s15 + $0x30] sm:$0xff] (%p3062_p5) }
 0x525   : > { %2260 = vrot.lane.b32.xlu1 %v1866_v0, %s3008_s30  ;;  %v1854_v50 = vpop.f32.mrf.mxu0  ;;  %2353 = vst [vmem:[%s2327_s13 + $0x60] sm:$0xff] (%p3062_p5), %v2352_v48 }
 0x526   : > { %v1865_v52 = vsel %vm3133_vm4, 1.0, %v1854_v50 }
 0x527   : > { %2258 = vrot.lane.b32.xlu0 %v1865_v52, %s3008_s30 }
 0x528   : > { %v2241_v54 = vpop.permute.xlu1 %2240 }
 0x529   : > { %v2295_v26 = vsel %vm487_vm2, %v1438_v53, %v2241_v54 }
 0x52a   : > { %v2239_v29 = vpop.permute.xlu0 %2238 }
 0x52b   : > { %v2294_v33 = vsel %vm487_vm2, %v1437_v41, %v2239_v29 }
 0x52c   : > { %v2245_v57 = vpop.permute.xlu1 %2244 }
 0x52d   : > { %v2297_v6 = vsel %vm487_vm2, %v1440_v56, %v2245_v57 }
 0x52e   : > { %v2243_v7 = vpop.permute.xlu0 %2242 }
 0x52f   : > { %v2296_v10 = vsel %vm487_vm2, %v1439_v38, %v2243_v7 }
 0x532   : > { %v2143_v11 = vpop.permute.xlu1 %2142 }
 0x533   : > { %v2175_v36 = vsel %vm2161_vm7, %v2171_v43, %v2143_v11 }
 0x534   : > { %2181 = vst [vmem:[%s3381_s15 + $0x18] sm:$0xff] %v2175_v36  ;;  %v2141_v61 = vpop.permute.xlu0 %2140 }
 0x535   : > { %v2174_v47 = vsel %vm2161_vm7, %v2170_v8, %v2141_v61 }
 0x536   : > { %2179 = vst [vmem:[%s3381_s15 + $0x8] sm:$0xff] %v2174_v47  ;;  %v2147_v39 = vpop.permute.xlu1 %2146 }
 0x537   : > { %v2177_v37 = vsel %vm2161_vm7, %v2173_v55, %v2147_v39 }
 0x538   : > { %2185 = vst [vmem:[%s3381_s15 + $0x38] sm:$0xff] %v2177_v37  ;;  %v2145_v14 = vpop.permute.xlu0 %2144 }
 0x539   : > { %v2176_v15 = vsel %vm2161_vm7, %v2172_v13, %v2145_v14 }
 0x53a   : > { %2183 = vst [vmem:[%s3381_s15 + $0x28] sm:$0xff] %v2176_v15 }
 0x53b   : > { %v2346_v46 = vld [vmem:[%s3381_s15 + $0x18] sm:$0xff] (%p3062_p5) }
 0x53c   : > { %2347 = vst [vmem:[%s2327_s13 + $0x28] sm:$0xff] (%p3062_p5), %v2346_v46 }
 0x53d   : > { %v2342_v42 = vld [vmem:[%s3381_s15 + $0x8] sm:$0xff] (%p3062_p5) }
 0x53e   : > { %2343 = vst [vmem:[%s2327_s13 + $0x8] sm:$0xff] (%p3062_p5), %v2342_v42 }
 0x53f   : > { %v2354_v5 = vld [vmem:[%s3381_s15 + $0x38] sm:$0xff] (%p3062_p5) }
 0x540   : > { %2355 = vst [vmem:[%s2327_s13 + $0x68] sm:$0xff] (%p3062_p5), %v2354_v5 }
 0x541   : > { %v2350_v1 = vld [vmem:[%s3381_s15 + $0x28] sm:$0xff] (%p3062_p5) }
 0x542   : > { %2351 = vst [vmem:[%s2327_s13 + $0x48] sm:$0xff] (%p3062_p5), %v2350_v1 }
 0x593   : > { %v2257_v17 = vpop.permute.xlu1 %2256 }
 0x594   : > { %v2946_v59 = vpop.f32.mrf.mxu1  ;;  %v2299_v20 = vsel %vm2156_vm6, %v2295_v26, %v2257_v17 }
 0x595   : > { %v2077_v44 = vsel %vm3149_vm5, 1.0, %v2946_v59  ;;  %v2255_v25 = vpop.permute.xlu0 %2254 }
 0x596   : > { %v2057_v58 = vpop.f32.mrf.mxu1  ;;  %2272 = vrot.lane.b32.xlu1 %v2077_v44, %s3006_s28  ;;  %v2298_v22 = vsel %vm2156_vm6, %v2294_v33, %v2255_v25 }
 0x597   : > { %v2076_v63 = vsel %vm3119_vm1, 1.0, %v2057_v58  ;;  %v2261_v18 = vpop.permute.xlu1 %2260 }
 0x598   : > { %v2949_v49 = vpop.f32.mrf.mxu1  ;;  %2270 = vrot.lane.b32.xlu0 %v2076_v63, %s3006_s28  ;;  %v2301_v24 = vsel %vm2156_vm6, %v2297_v6, %v2261_v18 }
 0x599   : > { %v2079_v62 = vsel %vm3127_vm3, 1.0, %v2949_v49  ;;  %v2259_v19 = vpop.permute.xlu0 %2258 }
 0x59a   : > { %v2067_v16 = vpop.f32.mrf.mxu1  ;;  %2276 = vrot.lane.b32.xlu1 %v2079_v62, %s3006_s28  ;;  %v2300_v31 = vsel %vm2156_vm6, %v2296_v10, %v2259_v19 }
 0x59b   : > { %v2078_v40 = vsel %vm3133_vm4, 1.0, %v2067_v16 }
 0x59c   : > { %2274 = vrot.lane.b32.xlu0 %v2078_v40, %s3006_s28 }
 0x608   : > { %v2273_v21 = vpop.permute.xlu1 %2272 }
 0x609   : > { %v2303_v30 = vsel %vm2161_vm7, %v2299_v20, %v2273_v21 }
 0x60a   : > { %2309 = vst [vmem:[%s3485_s5 + $0x18] sm:$0xff] %v2303_v30  ;;  %v2271_v23 = vpop.permute.xlu0 %2270 }
 0x60b   : > { %v2302_v34 = vsel %vm2161_vm7, %v2298_v22, %v2271_v23 }
 0x60c   : > { %2307 = vst [vmem:[%s3485_s5 + $0x8] sm:$0xff] %v2302_v34  ;;  %v2277_v27 = vpop.permute.xlu1 %2276  ;;  %2324 = sbr.rel (!%p3062_p5) target bundleno = 1553 (0x611), region = 74 }
 0x60d   : > { %v2305_v28 = vsel %vm2161_vm7, %v2301_v24, %v2277_v27 }
 0x60e   : > { %2313 = vst [vmem:[%s3485_s5 + $0x38] sm:$0xff] %v2305_v28  ;;  %v2275_v32 = vpop.permute.xlu0 %2274 }
 0x60f   : > { %v2304_v35 = vsel %vm2161_vm7, %v2300_v31, %v2275_v32 }
 0x610   : > { %2311 = vst [vmem:[%s3485_s5 + $0x28] sm:$0xff] %v2304_v35 }
 0x611 PF: > { %2361 = sbr.rel (!%p3062_p5) target bundleno = 1561 (0x619), region = 97  ;;  %s2629_s14 = sshll.u32 (%p3062_p5), %s3050_s18, 4  ;;  %v2377_v0 = vld [vmem:[%s3485_s5] sm:$0xff] (%p3062_p5)  ;;  %v2381_v51 = vld [vmem:[%s3485_s5 + $0x10] sm:$0xff] (%p3062_p5)  ;;  %v2383_v52 = vld [vmem:[%s3485_s5 + $0x18] sm:$0xff] (%p3062_p5) }
 0x612   : > { %s2364_s21 = scalar_lea.vmem (%p3062_p5), %s3670_s4, %s2629_s14  ;;  %v2385_v53 = vld [vmem:[%s3485_s5 + $0x20] sm:$0xff] (%p3062_p5)  ;;  %v2389_v26 = vld [vmem:[%s3485_s5 + $0x30] sm:$0xff] (%p3062_p5) }
 0x613   : > { %v2379_v50 = vld [vmem:[%s3485_s5 + $0x8] sm:$0xff] (%p3062_p5)  ;;  %2378 = vst [vmem:[%s2364_s21] sm:$0xff] (%p3062_p5), %v2377_v0  ;;  %2382 = vst [vmem:[%s2364_s21 + $0x20] sm:$0xff] (%p3062_p5), %v2381_v51 }
 0x614   : > { %2380 = vst [vmem:[%s2364_s21 + $0x8] sm:$0xff] (%p3062_p5), %v2379_v50  ;;  %2384 = vst [vmem:[%s2364_s21 + $0x28] sm:$0xff] (%p3062_p5), %v2383_v52 }
 0x615   : > { %2386 = vst [vmem:[%s2364_s21 + $0x40] sm:$0xff] (%p3062_p5), %v2385_v53  ;;  %v2391_v41 = vld [vmem:[%s3485_s5 + $0x38] sm:$0xff] (%p3062_p5)  ;;  %2390 = vst [vmem:[%s2364_s21 + $0x60] sm:$0xff] (%p3062_p5), %v2389_v26 }
 0x616   : > { %2392 = vst [vmem:[%s2364_s21 + $0x68] sm:$0xff] %v2391_v41 }
 0x617   : > { %v2387_v54 = vld [vmem:[%s3485_s5 + $0x28] sm:$0xff] }
 0x618   : > { %2388 = vst [vmem:[%s2364_s21 + $0x48] sm:$0xff] %v2387_v54 }
 0x619 PF: > { %p12_p11 = scmp.ge.s32.totalorder %s3052_s19, 4   ;;  %s3680_s15 = smov %s2999_s16 }
 0x61a   : > { %s3681_s16 = smov %s3060_s22  ;;  %s3682_s17 = smov %s3052_s19 }
 0x61b   :  { %14 = sbr.rel (!%p12_p11) target bundleno = 2 (0x2), region = 173 }

</bundles_post_ra>
